<compile_context>
chip_gen: v6e
topology: v6e:2x2x1
jax: 0.10.0
libtpu: 0.0.40
codegen_flags: <defaults>
</compile_context>

<pallas_src>
import functools

import jax
import jax.numpy as jnp
from jax.experimental import pallas as pl
from jax.experimental.pallas import tpu as pltpu


def _layernorm(x, w, b, eps=1e-5):
    mu = jnp.mean(x, axis=-1, keepdims=True)
    xc = x - mu
    var = jnp.mean(xc * xc, axis=-1, keepdims=True)
    return xc * jax.lax.rsqrt(var + eps) * w + b


def _gelu_exact(x):
    # PyTorch nn.GELU() default: exact erf GELU.
    return 0.5 * x * (1.0 + jax.lax.erf(x * 0.7071067811865476))


def block_kernel(x_ref, ln1_w_ref, ln1_b_ref, wq_ref, wk_ref, wv_ref,
                 proj_w_ref, proj_b_ref, ln2_w_ref, ln2_b_ref,
                 fc1_w_ref, fc1_b_ref, fc2_w_ref, fc2_b_ref,
                 out_ref, *, num_heads):
    f32 = jnp.float32
    bf16 = jnp.bfloat16
    H = num_heads

    # Residual path / elementwise work stays f32 (v5e VPU/EUP have no bf16).
    x = x_ref[...].astype(f32)                              # (N, C)

    # ---- norm1 (f32 VPU) -> bf16 MXU operand ----
    h16 = _layernorm(x, ln1_w_ref[...], ln1_b_ref[...]).astype(bf16)

    # ---- q/k/v, head-major straight from the MXU ----
    # Weight refs are (H, C, hd) slabs (scale already folded into wq in the wrapper), so
    # each head's (N, hd) tile is a full K=C contraction and no lane slicing / XLU
    # relayout is ever needed; the dense f32 (N, C) q/k/v are never materialized.
    def _heads(w_ref):
        hs = [jnp.dot(h16, w_ref[i], preferred_element_type=f32) for i in range(H)]
        return jnp.stack(hs, axis=0).astype(bf16)           # (H, N, hd)

    q3 = _heads(wq_ref)
    k3 = _heads(wk_ref)
    v3 = _heads(wv_ref)

    # ---- batched-head attention (f32 accumulation) ----
    s = jnp.einsum("hqd,hkd->hqk", q3, k3, preferred_element_type=f32)   # (H, N, N)
    s = s - jnp.max(s, axis=-1, keepdims=True)
    p = jnp.exp(s)
    p = p * pl.reciprocal(jnp.sum(p, axis=-1, keepdims=True), approx=True)   # EUP recip

    o3 = jnp.einsum("hqk,hkd->hqd", p.astype(bf16), v3,
                    preferred_element_type=f32)                          # (H, N, hd)

    # ---- output projection: reassemble heads to (N, C) once, single K=C MXU matmul ----
    o16 = jnp.concatenate([o3[i] for i in range(H)], axis=-1).astype(bf16)   # (N, C)
    y = jnp.dot(o16, proj_w_ref[...], preferred_element_type=f32) + proj_b_ref[...]

    # Dropout / DropPath are identity (p = 0.0, eval mode).
    x1 = x + y

    # ---- norm2 + MLP (GELU) ----
    h2 = _layernorm(x1, ln2_w_ref[...], ln2_b_ref[...])
    m = jnp.dot(h2.astype(bf16), fc1_w_ref[...],
                preferred_element_type=f32) + fc1_b_ref[...]
    m = _gelu_exact(m)
    m = jnp.dot(m.astype(bf16), fc2_w_ref[...],
                preferred_element_type=f32) + fc2_b_ref[...]

    out_ref[...] = (x1 + m).astype(out_ref.dtype)


def _vmem_limit_bytes(weight_arrays, N, C, hidden, H, hd, x_itemsize):
    """Computed VMEM budget: resident weights + double-buffered x/out blocks + live
    intermediates + margin, capped below v7x's 64 MiB physical per-core VMEM."""
    def _pad(n, m):
        return -(-n // m) * m

    def _padded_bytes(a):
        lead = 1
        for d in a.shape[:-2]:
            lead *= d
        sub = _pad(a.shape[-2] if a.ndim >= 2 else 1, 8)
        lane = _pad(a.shape[-1], 128)
        return lead * sub * lane * a.dtype.itemsize

    weights = sum(_padded_bytes(a) for a in weight_arrays)
    rows = _pad(N, 8)
    io = 2 * 2 * rows * _pad(C, 128) * x_itemsize                 # double-buffered x/out
    inter = rows * _pad(C, 128) * 4 * 6                           # x, h, y, x1, h2, out (f32)
    inter += 3 * H * rows * _pad(hd, 128) * 6                     # q3/k3/v3 (f32 + bf16 copies)
    inter += 2 * H * rows * _pad(N, 128) * 4                      # scores + probs (f32)
    inter += rows * _pad(hidden, 128) * 4 * 2                     # MLP hidden (f32, x2)
    need = weights + io + inter + (4 << 20)                       # compiler scratch margin

    try:
        cap = getattr(pltpu.get_tpu_info(), "vmem_capacity_bytes", 64 << 20)
    except Exception:  # pragma: no cover - conservative fallback
        cap = 64 << 20                                            # v7x per-core physical VMEM
    # Floor gives comfortable headroom at demo shapes; cap keeps pipeline headroom on v7x.
    return int(min(max(need, 16 << 20), min(int(0.75 * cap), 48 << 20)))


def vit_block(x, params, num_heads):
    B, N, C = x.shape
    H = num_heads
    hd = C // H
    bf16 = jnp.bfloat16
    scale = hd ** -0.5

    # Pre-split the qkv weight into per-head (H, C, hd) slabs in plain JAX (free, one-time),
    # folding the attention scale into wq BEFORE the bf16 cast. Column layout matches the
    # PyTorch (3, H, hd) ordering: q=[0:C], k=[C:2C], v=[2C:3C]; head i = cols [i*hd:(i+1)*hd].
    qkv_w = params["qkv_w"]

    def _head_slabs(w):                                   # (C, C) -> (H, C, hd)
        return jnp.transpose(w.reshape(C, H, hd), (1, 0, 2))

    wq3 = _head_slabs(qkv_w[:, :C] * scale).astype(bf16)
    wk3 = _head_slabs(qkv_w[:, C:2 * C]).astype(bf16)
    wv3 = _head_slabs(qkv_w[:, 2 * C:]).astype(bf16)
    proj_w = params["proj_w"].astype(bf16)                # dense (C, C): single K=C contraction
    fc1_w = params["fc1_w"].astype(bf16)
    fc2_w = params["fc2_w"].astype(bf16)
    hidden = fc1_w.shape[1]

    weights = [params["ln1_w"], params["ln1_b"], wq3, wk3, wv3,
               proj_w, params["proj_b"], params["ln2_w"], params["ln2_b"],
               fc1_w, params["fc1_b"], fc2_w, params["fc2_b"]]

    # Weights / small params: whole array resident in VMEM (constant block index across the
    # batch grid => fetched once, not part of the double-buffered pipeline).
    w_spec = pl.BlockSpec(memory_space=pltpu.MemorySpace.VMEM)
    x_spec = pl.BlockSpec((pl.Squeezed(), N, C), lambda b: (b, 0, 0))
    out_spec = pl.BlockSpec((pl.Squeezed(), N, C), lambda b: (b, 0, 0))

    kernel = functools.partial(block_kernel, num_heads=num_heads)
    return pl.pallas_call(
        kernel,
        out_shape=jax.ShapeDtypeStruct((B, N, C), x.dtype),
        grid=(B,),
        in_specs=[x_spec] + [w_spec] * 13,
        out_specs=out_spec,
        compiler_params=pltpu.CompilerParams(
            dimension_semantics=("parallel",),
            vmem_limit_bytes=_vmem_limit_bytes(weights, N, C, hidden, H, hd,
                                               x.dtype.itemsize),
        ),
    )(x, *weights)


# ---------------- pure-JAX f32 reference (faithful to the PyTorch Block) ----------------
def vit_block_ref(x, params, num_heads):
    B, N, C = x.shape
    H = num_heads
    hd = C // H
    scale = hd ** -0.5

    h = _layernorm(x, params["ln1_w"], params["ln1_b"])
    qkv = h @ params["qkv_w"]                                       # (B, N, 3C), no bias
    qkv = qkv.reshape(B, N, 3, H, hd).transpose(2, 0, 3, 1, 4)
    q, k, v = qkv[0], qkv[1], qkv[2]                                # (B, H, N, hd)
    attn = jnp.einsum("bhqd,bhkd->bhqk", q, k) * scale
    attn = jax.nn.softmax(attn, axis=-1)
    y = jnp.einsum("bhqk,bhkd->bhqd", attn, v)
    y = y.transpose(0, 2, 1, 3).reshape(B, N, C)
    y = y @ params["proj_w"] + params["proj_b"]
    x1 = x + y

    h2 = _layernorm(x1, params["ln2_w"], params["ln2_b"])
    m = _gelu_exact(h2 @ params["fc1_w"] + params["fc1_b"])
    m = m @ params["fc2_w"] + params["fc2_b"]
    return x1 + m


def init_params(key, dim, mlp_ratio=4.0):
    hidden = int(dim * mlp_ratio)
    ks = jax.random.split(key, 11)
    std = 0.02
    nrm = jax.random.normal
    return {
        "ln1_w": 1.0 + std * nrm(ks[0], (1, dim), jnp.float32),
        "ln1_b": std * nrm(ks[1], (1, dim), jnp.float32),
        "qkv_w": std * nrm(ks[2], (dim, 3 * dim), jnp.float32),   # (in, out); no qkv bias
        "proj_w": std * nrm(ks[3], (dim, dim), jnp.float32),
        "proj_b": std * nrm(ks[4], (1, dim), jnp.float32),
        "ln2_w": 1.0 + std * nrm(ks[5], (1, dim), jnp.float32),
        "ln2_b": std * nrm(ks[6], (1, dim), jnp.float32),
        "fc1_w": std * nrm(ks[7], (dim, hidden), jnp.float32),
        "fc1_b": std * nrm(ks[8], (1, hidden), jnp.float32),
        "fc2_w": std * nrm(ks[9], (hidden, dim), jnp.float32),
        "fc2_b": std * nrm(ks[10], (1, dim), jnp.float32),
    }


if __name__ == "__main__":
    # Small but TPU-friendly shapes: C is a multiple of 128 (lane-dense last dim),
    # N is a multiple of 8 (sublane), B=2 keeps two grid steps available for megacore.
    B, N, C = 2, 16, 128
    num_heads = 4

    key = jax.random.PRNGKey(0)
    kx, kp = jax.random.split(key)
    x = jax.random.normal(kx, (B, N, C), jnp.float32)
    params = init_params(kp, C, mlp_ratio=4.0)

    out = jax.block_until_ready(vit_block(x, params, num_heads))
    ref = vit_block_ref(x, params, num_heads)

    assert out.shape == (B, N, C)
    # Tolerance accounts for deliberate bf16 MXU inputs (f32 accumulation) and the
    # approximate EUP reciprocal in the softmax; observed error is ~1e-3.
    assert jnp.allclose(out, ref, rtol=2e-2, atol=2e-2), \
        "Pallas output mismatch vs JAX reference"

    print("KERNEL_OK")
</pallas_src>

<mosaic_0001>
module attributes {stable_mosaic.version = 11 : i64} {
  func.func @block_kernel(%arg0: i32, %arg1: memref<1x16x128xf32, #tpu.memory_space<vmem>>, %arg2: memref<1x128xf32, #tpu.memory_space<vmem>>, %arg3: memref<1x128xf32, #tpu.memory_space<vmem>>, %arg4: memref<4x128x32xbf16, #tpu.memory_space<vmem>>, %arg5: memref<4x128x32xbf16, #tpu.memory_space<vmem>>, %arg6: memref<4x128x32xbf16, #tpu.memory_space<vmem>>, %arg7: memref<128x128xbf16, #tpu.memory_space<vmem>>, %arg8: memref<1x128xf32, #tpu.memory_space<vmem>>, %arg9: memref<1x128xf32, #tpu.memory_space<vmem>>, %arg10: memref<1x128xf32, #tpu.memory_space<vmem>>, %arg11: memref<128x512xbf16, #tpu.memory_space<vmem>>, %arg12: memref<1x512xf32, #tpu.memory_space<vmem>>, %arg13: memref<512x128xbf16, #tpu.memory_space<vmem>>, %arg14: memref<1x128xf32, #tpu.memory_space<vmem>>, %arg15: memref<1x16x128xf32, #tpu.memory_space<vmem>>) attributes {dimension_semantics = [#tpu.dimension_semantics<parallel>], iteration_bounds = array<i64: 2>, scalar_prefetch = 0 : i64, scratch_operands = 0 : i64, tpu.core_type = #tpu.core_type<tc>, window_params = [{transform_indices = @transform_0, window_bounds = array<i64: 1, 16, 128>}, {pipeline_mode = #tpu.pipeline_mode<synchronous>, transform_indices = @transform_1, window_bounds = array<i64: 1, 128>}, {pipeline_mode = #tpu.pipeline_mode<synchronous>, transform_indices = @transform_2, window_bounds = array<i64: 1, 128>}, {pipeline_mode = #tpu.pipeline_mode<synchronous>, transform_indices = @transform_3, window_bounds = array<i64: 4, 128, 32>}, {pipeline_mode = #tpu.pipeline_mode<synchronous>, transform_indices = @transform_4, window_bounds = array<i64: 4, 128, 32>}, {pipeline_mode = #tpu.pipeline_mode<synchronous>, transform_indices = @transform_5, window_bounds = array<i64: 4, 128, 32>}, {pipeline_mode = #tpu.pipeline_mode<synchronous>, transform_indices = @transform_6, window_bounds = array<i64: 128, 128>}, {pipeline_mode = #tpu.pipeline_mode<synchronous>, transform_indices = @transform_7, window_bounds = array<i64: 1, 128>}, {pipeline_mode = #tpu.pipeline_mode<synchronous>, transform_indices = @transform_8, window_bounds = array<i64: 1, 128>}, {pipeline_mode = #tpu.pipeline_mode<synchronous>, transform_indices = @transform_9, window_bounds = array<i64: 1, 128>}, {pipeline_mode = #tpu.pipeline_mode<synchronous>, transform_indices = @transform_10, window_bounds = array<i64: 128, 512>}, {pipeline_mode = #tpu.pipeline_mode<synchronous>, transform_indices = @transform_11, window_bounds = array<i64: 1, 512>}, {pipeline_mode = #tpu.pipeline_mode<synchronous>, transform_indices = @transform_12, window_bounds = array<i64: 512, 128>}, {pipeline_mode = #tpu.pipeline_mode<synchronous>, transform_indices = @transform_13, window_bounds = array<i64: 1, 128>}, {transform_indices = @transform_14, window_bounds = array<i64: 1, 16, 128>}]} {
    %c0 = arith.constant 0 : index
    %c0_0 = arith.constant 0 : index
    %c0_1 = arith.constant 0 : index
    %0 = vector.load %arg1[%c0, %c0_0, %c0_1] : memref<1x16x128xf32, #tpu.memory_space<vmem>>, vector<1x16x128xf32>
    %1 = vector.shape_cast %0 : vector<1x16x128xf32> to vector<16x128xf32>
    %c0_2 = arith.constant 0 : index
    %c0_3 = arith.constant 0 : index
    %2 = vector.load %arg2[%c0_2, %c0_3] : memref<1x128xf32, #tpu.memory_space<vmem>>, vector<1x128xf32>
    %c0_4 = arith.constant 0 : index
    %c0_5 = arith.constant 0 : index
    %3 = vector.load %arg3[%c0_4, %c0_5] : memref<1x128xf32, #tpu.memory_space<vmem>>, vector<1x128xf32>
    %cst = arith.constant dense<0.000000e+00> : vector<16xf32>
    %4 = vector.multi_reduction <add>, %1, %cst [1] : vector<16x128xf32> to vector<16xf32>
    %5 = vector.shape_cast %4 : vector<16xf32> to vector<16x1xf32>
    %cst_6 = arith.constant 1.280000e+02 : f32
    %6 = vector.broadcast %cst_6 : f32 to vector<16x1xf32>
    %7 = arith.divf %5, %6 : vector<16x1xf32>
    %8 = vector.broadcast %7 : vector<16x1xf32> to vector<16x128xf32>
    %9 = arith.subf %1, %8 : vector<16x128xf32>
    %10 = arith.mulf %9, %9 : vector<16x128xf32>
    %cst_7 = arith.constant dense<0.000000e+00> : vector<16xf32>
    %11 = vector.multi_reduction <add>, %10, %cst_7 [1] : vector<16x128xf32> to vector<16xf32>
    %12 = vector.shape_cast %11 : vector<16xf32> to vector<16x1xf32>
    %cst_8 = arith.constant 1.280000e+02 : f32
    %13 = vector.broadcast %cst_8 : f32 to vector<16x1xf32>
    %14 = arith.divf %12, %13 : vector<16x1xf32>
    %cst_9 = arith.constant 9.99999974E-6 : f32
    %15 = vector.broadcast %cst_9 : f32 to vector<16x1xf32>
    %16 = arith.addf %14, %15 : vector<16x1xf32>
    %17 = math.rsqrt %16 : vector<16x1xf32>
    %18 = vector.broadcast %17 : vector<16x1xf32> to vector<16x128xf32>
    %19 = arith.mulf %9, %18 : vector<16x128xf32>
    %20 = vector.broadcast %2 : vector<1x128xf32> to vector<16x128xf32>
    %21 = arith.mulf %19, %20 : vector<16x128xf32>
    %22 = vector.broadcast %3 : vector<1x128xf32> to vector<16x128xf32>
    %23 = arith.addf %21, %22 : vector<16x128xf32>
    %24 = arith.truncf %23 : vector<16x128xf32> to vector<16x128xbf16>
    %c0_10 = arith.constant 0 : index
    %c0_11 = arith.constant 0 : index
    %c0_12 = arith.constant 0 : index
    %25 = vector.load %arg4[%c0_10, %c0_11, %c0_12] : memref<4x128x32xbf16, #tpu.memory_space<vmem>>, vector<1x128x32xbf16>
    %26 = vector.shape_cast %25 : vector<1x128x32xbf16> to vector<128x32xbf16>
    %cst_13 = arith.constant dense<0.000000e+00> : vector<16x32xf32>
    %27 = tpu.matmul %24, %26, %cst_13 {dimension_numbers = #tpu.dot_dimension_numbers<[1], [0], [0], [1], [0, 0, 1, 1], [], []>} : vector<16x128xbf16>, vector<128x32xbf16>, vector<16x32xf32> -> vector<16x32xf32>
    %c1 = arith.constant 1 : index
    %c0_14 = arith.constant 0 : index
    %c0_15 = arith.constant 0 : index
    %28 = vector.load %arg4[%c1, %c0_14, %c0_15] : memref<4x128x32xbf16, #tpu.memory_space<vmem>>, vector<1x128x32xbf16>
    %29 = vector.shape_cast %28 : vector<1x128x32xbf16> to vector<128x32xbf16>
    %cst_16 = arith.constant dense<0.000000e+00> : vector<16x32xf32>
    %30 = tpu.matmul %24, %29, %cst_16 {dimension_numbers = #tpu.dot_dimension_numbers<[1], [0], [0], [1], [0, 0, 1, 1], [], []>} : vector<16x128xbf16>, vector<128x32xbf16>, vector<16x32xf32> -> vector<16x32xf32>
    %c2 = arith.constant 2 : index
    %c0_17 = arith.constant 0 : index
    %c0_18 = arith.constant 0 : index
    %31 = vector.load %arg4[%c2, %c0_17, %c0_18] : memref<4x128x32xbf16, #tpu.memory_space<vmem>>, vector<1x128x32xbf16>
    %32 = vector.shape_cast %31 : vector<1x128x32xbf16> to vector<128x32xbf16>
    %cst_19 = arith.constant dense<0.000000e+00> : vector<16x32xf32>
    %33 = tpu.matmul %24, %32, %cst_19 {dimension_numbers = #tpu.dot_dimension_numbers<[1], [0], [0], [1], [0, 0, 1, 1], [], []>} : vector<16x128xbf16>, vector<128x32xbf16>, vector<16x32xf32> -> vector<16x32xf32>
    %c3 = arith.constant 3 : index
    %c0_20 = arith.constant 0 : index
    %c0_21 = arith.constant 0 : index
    %34 = vector.load %arg4[%c3, %c0_20, %c0_21] : memref<4x128x32xbf16, #tpu.memory_space<vmem>>, vector<1x128x32xbf16>
    %35 = vector.shape_cast %34 : vector<1x128x32xbf16> to vector<128x32xbf16>
    %cst_22 = arith.constant dense<0.000000e+00> : vector<16x32xf32>
    %36 = tpu.matmul %24, %35, %cst_22 {dimension_numbers = #tpu.dot_dimension_numbers<[1], [0], [0], [1], [0, 0, 1, 1], [], []>} : vector<16x128xbf16>, vector<128x32xbf16>, vector<16x32xf32> -> vector<16x32xf32>
    %37 = vector.shape_cast %27 : vector<16x32xf32> to vector<1x16x32xf32>
    %38 = vector.shape_cast %30 : vector<16x32xf32> to vector<1x16x32xf32>
    %39 = vector.shape_cast %33 : vector<16x32xf32> to vector<1x16x32xf32>
    %40 = vector.shape_cast %36 : vector<16x32xf32> to vector<1x16x32xf32>
    %41 = tpu.concatenate %37, %38, %39, %40 in 0 : vector<1x16x32xf32>, vector<1x16x32xf32>, vector<1x16x32xf32>, vector<1x16x32xf32> -> vector<4x16x32xf32>
    %42 = arith.truncf %41 : vector<4x16x32xf32> to vector<4x16x32xbf16>
    %c0_23 = arith.constant 0 : index
    %c0_24 = arith.constant 0 : index
    %c0_25 = arith.constant 0 : index
    %43 = vector.load %arg5[%c0_23, %c0_24, %c0_25] : memref<4x128x32xbf16, #tpu.memory_space<vmem>>, vector<1x128x32xbf16>
    %44 = vector.shape_cast %43 : vector<1x128x32xbf16> to vector<128x32xbf16>
    %cst_26 = arith.constant dense<0.000000e+00> : vector<16x32xf32>
    %45 = tpu.matmul %24, %44, %cst_26 {dimension_numbers = #tpu.dot_dimension_numbers<[1], [0], [0], [1], [0, 0, 1, 1], [], []>} : vector<16x128xbf16>, vector<128x32xbf16>, vector<16x32xf32> -> vector<16x32xf32>
    %c1_27 = arith.constant 1 : index
    %c0_28 = arith.constant 0 : index
    %c0_29 = arith.constant 0 : index
    %46 = vector.load %arg5[%c1_27, %c0_28, %c0_29] : memref<4x128x32xbf16, #tpu.memory_space<vmem>>, vector<1x128x32xbf16>
    %47 = vector.shape_cast %46 : vector<1x128x32xbf16> to vector<128x32xbf16>
    %cst_30 = arith.constant dense<0.000000e+00> : vector<16x32xf32>
    %48 = tpu.matmul %24, %47, %cst_30 {dimension_numbers = #tpu.dot_dimension_numbers<[1], [0], [0], [1], [0, 0, 1, 1], [], []>} : vector<16x128xbf16>, vector<128x32xbf16>, vector<16x32xf32> -> vector<16x32xf32>
    %c2_31 = arith.constant 2 : index
    %c0_32 = arith.constant 0 : index
    %c0_33 = arith.constant 0 : index
    %49 = vector.load %arg5[%c2_31, %c0_32, %c0_33] : memref<4x128x32xbf16, #tpu.memory_space<vmem>>, vector<1x128x32xbf16>
    %50 = vector.shape_cast %49 : vector<1x128x32xbf16> to vector<128x32xbf16>
    %cst_34 = arith.constant dense<0.000000e+00> : vector<16x32xf32>
    %51 = tpu.matmul %24, %50, %cst_34 {dimension_numbers = #tpu.dot_dimension_numbers<[1], [0], [0], [1], [0, 0, 1, 1], [], []>} : vector<16x128xbf16>, vector<128x32xbf16>, vector<16x32xf32> -> vector<16x32xf32>
    %c3_35 = arith.constant 3 : index
    %c0_36 = arith.constant 0 : index
    %c0_37 = arith.constant 0 : index
    %52 = vector.load %arg5[%c3_35, %c0_36, %c0_37] : memref<4x128x32xbf16, #tpu.memory_space<vmem>>, vector<1x128x32xbf16>
    %53 = vector.shape_cast %52 : vector<1x128x32xbf16> to vector<128x32xbf16>
    %cst_38 = arith.constant dense<0.000000e+00> : vector<16x32xf32>
    %54 = tpu.matmul %24, %53, %cst_38 {dimension_numbers = #tpu.dot_dimension_numbers<[1], [0], [0], [1], [0, 0, 1, 1], [], []>} : vector<16x128xbf16>, vector<128x32xbf16>, vector<16x32xf32> -> vector<16x32xf32>
    %55 = vector.shape_cast %45 : vector<16x32xf32> to vector<1x16x32xf32>
    %56 = vector.shape_cast %48 : vector<16x32xf32> to vector<1x16x32xf32>
    %57 = vector.shape_cast %51 : vector<16x32xf32> to vector<1x16x32xf32>
    %58 = vector.shape_cast %54 : vector<16x32xf32> to vector<1x16x32xf32>
    %59 = tpu.concatenate %55, %56, %57, %58 in 0 : vector<1x16x32xf32>, vector<1x16x32xf32>, vector<1x16x32xf32>, vector<1x16x32xf32> -> vector<4x16x32xf32>
    %60 = arith.truncf %59 : vector<4x16x32xf32> to vector<4x16x32xbf16>
    %c0_39 = arith.constant 0 : index
    %c0_40 = arith.constant 0 : index
    %c0_41 = arith.constant 0 : index
    %61 = vector.load %arg6[%c0_39, %c0_40, %c0_41] : memref<4x128x32xbf16, #tpu.memory_space<vmem>>, vector<1x128x32xbf16>
    %62 = vector.shape_cast %61 : vector<1x128x32xbf16> to vector<128x32xbf16>
    %cst_42 = arith.constant dense<0.000000e+00> : vector<16x32xf32>
    %63 = tpu.matmul %24, %62, %cst_42 {dimension_numbers = #tpu.dot_dimension_numbers<[1], [0], [0], [1], [0, 0, 1, 1], [], []>} : vector<16x128xbf16>, vector<128x32xbf16>, vector<16x32xf32> -> vector<16x32xf32>
    %c1_43 = arith.constant 1 : index
    %c0_44 = arith.constant 0 : index
    %c0_45 = arith.constant 0 : index
    %64 = vector.load %arg6[%c1_43, %c0_44, %c0_45] : memref<4x128x32xbf16, #tpu.memory_space<vmem>>, vector<1x128x32xbf16>
    %65 = vector.shape_cast %64 : vector<1x128x32xbf16> to vector<128x32xbf16>
    %cst_46 = arith.constant dense<0.000000e+00> : vector<16x32xf32>
    %66 = tpu.matmul %24, %65, %cst_46 {dimension_numbers = #tpu.dot_dimension_numbers<[1], [0], [0], [1], [0, 0, 1, 1], [], []>} : vector<16x128xbf16>, vector<128x32xbf16>, vector<16x32xf32> -> vector<16x32xf32>
    %c2_47 = arith.constant 2 : index
    %c0_48 = arith.constant 0 : index
    %c0_49 = arith.constant 0 : index
    %67 = vector.load %arg6[%c2_47, %c0_48, %c0_49] : memref<4x128x32xbf16, #tpu.memory_space<vmem>>, vector<1x128x32xbf16>
    %68 = vector.shape_cast %67 : vector<1x128x32xbf16> to vector<128x32xbf16>
    %cst_50 = arith.constant dense<0.000000e+00> : vector<16x32xf32>
    %69 = tpu.matmul %24, %68, %cst_50 {dimension_numbers = #tpu.dot_dimension_numbers<[1], [0], [0], [1], [0, 0, 1, 1], [], []>} : vector<16x128xbf16>, vector<128x32xbf16>, vector<16x32xf32> -> vector<16x32xf32>
    %c3_51 = arith.constant 3 : index
    %c0_52 = arith.constant 0 : index
    %c0_53 = arith.constant 0 : index
    %70 = vector.load %arg6[%c3_51, %c0_52, %c0_53] : memref<4x128x32xbf16, #tpu.memory_space<vmem>>, vector<1x128x32xbf16>
    %71 = vector.shape_cast %70 : vector<1x128x32xbf16> to vector<128x32xbf16>
    %cst_54 = arith.constant dense<0.000000e+00> : vector<16x32xf32>
    %72 = tpu.matmul %24, %71, %cst_54 {dimension_numbers = #tpu.dot_dimension_numbers<[1], [0], [0], [1], [0, 0, 1, 1], [], []>} : vector<16x128xbf16>, vector<128x32xbf16>, vector<16x32xf32> -> vector<16x32xf32>
    %73 = vector.shape_cast %63 : vector<16x32xf32> to vector<1x16x32xf32>
    %74 = vector.shape_cast %66 : vector<16x32xf32> to vector<1x16x32xf32>
    %75 = vector.shape_cast %69 : vector<16x32xf32> to vector<1x16x32xf32>
    %76 = vector.shape_cast %72 : vector<16x32xf32> to vector<1x16x32xf32>
    %77 = tpu.concatenate %73, %74, %75, %76 in 0 : vector<1x16x32xf32>, vector<1x16x32xf32>, vector<1x16x32xf32>, vector<1x16x32xf32> -> vector<4x16x32xf32>
    %78 = arith.truncf %77 : vector<4x16x32xf32> to vector<4x16x32xbf16>
    "tpu.trace_start"() <{level = 10 : i32, message = "hqd,hkd->hqk"}> : () -> ()
    %cst_55 = arith.constant dense<0.000000e+00> : vector<4x16x16xf32>
    %79 = tpu.matmul %42, %60, %cst_55 {dimension_numbers = #tpu.dot_dimension_numbers<[2], [2], [1], [1], [0, 0, 0, 1, 1, 1], [0], [0]>} : vector<4x16x32xbf16>, vector<4x16x32xbf16>, vector<4x16x16xf32> -> vector<4x16x16xf32>
    "tpu.trace_stop"() : () -> ()
    %cst_56 = arith.constant dense<0xFF800000> : vector<4x16xf32>
    %80 = vector.multi_reduction <maximumf>, %79, %cst_56 [2] : vector<4x16x16xf32> to vector<4x16xf32>
    %81 = vector.shape_cast %80 : vector<4x16xf32> to vector<4x16x1xf32>
    %82 = vector.broadcast %81 : vector<4x16x1xf32> to vector<4x16x16xf32>
    %83 = arith.subf %79, %82 : vector<4x16x16xf32>
    %84 = math.exp %83 : vector<4x16x16xf32>
    %cst_57 = arith.constant dense<0.000000e+00> : vector<4x16xf32>
    %85 = vector.multi_reduction <add>, %84, %cst_57 [2] : vector<4x16x16xf32> to vector<4x16xf32>
    %86 = vector.shape_cast %85 : vector<4x16xf32> to vector<4x16x1xf32>
    %87 = tpu.reciprocal %86 {approx = true} : vector<4x16x1xf32> -> vector<4x16x1xf32>
    %88 = vector.broadcast %87 : vector<4x16x1xf32> to vector<4x16x16xf32>
    %89 = arith.mulf %84, %88 : vector<4x16x16xf32>
    %90 = arith.truncf %89 : vector<4x16x16xf32> to vector<4x16x16xbf16>
    "tpu.trace_start"() <{level = 10 : i32, message = "hqk,hkd->hqd"}> : () -> ()
    %cst_58 = arith.constant dense<0.000000e+00> : vector<4x16x32xf32>
    %91 = tpu.matmul %90, %78, %cst_58 {dimension_numbers = #tpu.dot_dimension_numbers<[2], [1], [1], [2], [0, 0, 0, 1, 1, 2], [0], [0]>} : vector<4x16x16xbf16>, vector<4x16x32xbf16>, vector<4x16x32xf32> -> vector<4x16x32xf32>
    "tpu.trace_stop"() : () -> ()
    %92 = vector.extract_strided_slice %91 {offsets = [0, 0, 0], sizes = [1, 16, 32], strides = [1, 1, 1]} : vector<4x16x32xf32> to vector<1x16x32xf32>
    %93 = vector.shape_cast %92 : vector<1x16x32xf32> to vector<16x32xf32>
    %94 = vector.extract_strided_slice %91 {offsets = [1, 0, 0], sizes = [1, 16, 32], strides = [1, 1, 1]} : vector<4x16x32xf32> to vector<1x16x32xf32>
    %95 = vector.shape_cast %94 : vector<1x16x32xf32> to vector<16x32xf32>
    %96 = vector.extract_strided_slice %91 {offsets = [2, 0, 0], sizes = [1, 16, 32], strides = [1, 1, 1]} : vector<4x16x32xf32> to vector<1x16x32xf32>
    %97 = vector.shape_cast %96 : vector<1x16x32xf32> to vector<16x32xf32>
    %98 = vector.extract_strided_slice %91 {offsets = [3, 0, 0], sizes = [1, 16, 32], strides = [1, 1, 1]} : vector<4x16x32xf32> to vector<1x16x32xf32>
    %99 = vector.shape_cast %98 : vector<1x16x32xf32> to vector<16x32xf32>
    %100 = tpu.concatenate %93, %95, %97, %99 in 1 : vector<16x32xf32>, vector<16x32xf32>, vector<16x32xf32>, vector<16x32xf32> -> vector<16x128xf32>
    %101 = arith.truncf %100 : vector<16x128xf32> to vector<16x128xbf16>
    %c0_59 = arith.constant 0 : index
    %c0_60 = arith.constant 0 : index
    %102 = vector.load %arg7[%c0_59, %c0_60] : memref<128x128xbf16, #tpu.memory_space<vmem>>, vector<128x128xbf16>
    %cst_61 = arith.constant dense<0.000000e+00> : vector<16x128xf32>
    %103 = tpu.matmul %101, %102, %cst_61 {dimension_numbers = #tpu.dot_dimension_numbers<[1], [0], [0], [1], [0, 0, 1, 1], [], []>} : vector<16x128xbf16>, vector<128x128xbf16>, vector<16x128xf32> -> vector<16x128xf32>
    %c0_62 = arith.constant 0 : index
    %c0_63 = arith.constant 0 : index
    %104 = vector.load %arg8[%c0_62, %c0_63] : memref<1x128xf32, #tpu.memory_space<vmem>>, vector<1x128xf32>
    %105 = vector.broadcast %104 : vector<1x128xf32> to vector<16x128xf32>
    %106 = arith.addf %103, %105 : vector<16x128xf32>
    %107 = arith.addf %1, %106 : vector<16x128xf32>
    %c0_64 = arith.constant 0 : index
    %c0_65 = arith.constant 0 : index
    %108 = vector.load %arg9[%c0_64, %c0_65] : memref<1x128xf32, #tpu.memory_space<vmem>>, vector<1x128xf32>
    %c0_66 = arith.constant 0 : index
    %c0_67 = arith.constant 0 : index
    %109 = vector.load %arg10[%c0_66, %c0_67] : memref<1x128xf32, #tpu.memory_space<vmem>>, vector<1x128xf32>
    %cst_68 = arith.constant dense<0.000000e+00> : vector<16xf32>
    %110 = vector.multi_reduction <add>, %107, %cst_68 [1] : vector<16x128xf32> to vector<16xf32>
    %111 = vector.shape_cast %110 : vector<16xf32> to vector<16x1xf32>
    %cst_69 = arith.constant 1.280000e+02 : f32
    %112 = vector.broadcast %cst_69 : f32 to vector<16x1xf32>
    %113 = arith.divf %111, %112 : vector<16x1xf32>
    %114 = vector.broadcast %113 : vector<16x1xf32> to vector<16x128xf32>
    %115 = arith.subf %107, %114 : vector<16x128xf32>
    %116 = arith.mulf %115, %115 : vector<16x128xf32>
    %cst_70 = arith.constant dense<0.000000e+00> : vector<16xf32>
    %117 = vector.multi_reduction <add>, %116, %cst_70 [1] : vector<16x128xf32> to vector<16xf32>
    %118 = vector.shape_cast %117 : vector<16xf32> to vector<16x1xf32>
    %cst_71 = arith.constant 1.280000e+02 : f32
    %119 = vector.broadcast %cst_71 : f32 to vector<16x1xf32>
    %120 = arith.divf %118, %119 : vector<16x1xf32>
    %cst_72 = arith.constant 9.99999974E-6 : f32
    %121 = vector.broadcast %cst_72 : f32 to vector<16x1xf32>
    %122 = arith.addf %120, %121 : vector<16x1xf32>
    %123 = math.rsqrt %122 : vector<16x1xf32>
    %124 = vector.broadcast %123 : vector<16x1xf32> to vector<16x128xf32>
    %125 = arith.mulf %115, %124 : vector<16x128xf32>
    %126 = vector.broadcast %108 : vector<1x128xf32> to vector<16x128xf32>
    %127 = arith.mulf %125, %126 : vector<16x128xf32>
    %128 = vector.broadcast %109 : vector<1x128xf32> to vector<16x128xf32>
    %129 = arith.addf %127, %128 : vector<16x128xf32>
    %130 = arith.truncf %129 : vector<16x128xf32> to vector<16x128xbf16>
    %c0_73 = arith.constant 0 : index
    %c0_74 = arith.constant 0 : index
    %131 = vector.load %arg11[%c0_73, %c0_74] : memref<128x512xbf16, #tpu.memory_space<vmem>>, vector<128x512xbf16>
    %cst_75 = arith.constant dense<0.000000e+00> : vector<16x512xf32>
    %132 = tpu.matmul %130, %131, %cst_75 {dimension_numbers = #tpu.dot_dimension_numbers<[1], [0], [0], [1], [0, 0, 1, 1], [], []>} : vector<16x128xbf16>, vector<128x512xbf16>, vector<16x512xf32> -> vector<16x512xf32>
    %c0_76 = arith.constant 0 : index
    %c0_77 = arith.constant 0 : index
    %133 = vector.load %arg12[%c0_76, %c0_77] : memref<1x512xf32, #tpu.memory_space<vmem>>, vector<1x512xf32>
    %134 = vector.broadcast %133 : vector<1x512xf32> to vector<16x512xf32>
    %135 = arith.addf %132, %134 : vector<16x512xf32>
    %cst_78 = arith.constant 5.000000e-01 : f32
    %136 = vector.broadcast %cst_78 : f32 to vector<16x512xf32>
    %137 = arith.mulf %136, %135 : vector<16x512xf32>
    %cst_79 = arith.constant 0.707106769 : f32
    %138 = vector.broadcast %cst_79 : f32 to vector<16x512xf32>
    %139 = arith.mulf %135, %138 : vector<16x512xf32>
    %140 = math.erf %139 : vector<16x512xf32>
    %cst_80 = arith.constant 1.000000e+00 : f32
    %141 = vector.broadcast %cst_80 : f32 to vector<16x512xf32>
    %142 = arith.addf %141, %140 : vector<16x512xf32>
    %143 = arith.mulf %137, %142 : vector<16x512xf32>
    %144 = arith.truncf %143 : vector<16x512xf32> to vector<16x512xbf16>
    %c0_81 = arith.constant 0 : index
    %c0_82 = arith.constant 0 : index
    %145 = vector.load %arg13[%c0_81, %c0_82] : memref<512x128xbf16, #tpu.memory_space<vmem>>, vector<512x128xbf16>
    %cst_83 = arith.constant dense<0.000000e+00> : vector<16x128xf32>
    %146 = tpu.matmul %144, %145, %cst_83 {dimension_numbers = #tpu.dot_dimension_numbers<[1], [0], [0], [1], [0, 0, 1, 1], [], []>} : vector<16x512xbf16>, vector<512x128xbf16>, vector<16x128xf32> -> vector<16x128xf32>
    %c0_84 = arith.constant 0 : index
    %c0_85 = arith.constant 0 : index
    %147 = vector.load %arg14[%c0_84, %c0_85] : memref<1x128xf32, #tpu.memory_space<vmem>>, vector<1x128xf32>
    %148 = vector.broadcast %147 : vector<1x128xf32> to vector<16x128xf32>
    %149 = arith.addf %146, %148 : vector<16x128xf32>
    %150 = arith.addf %107, %149 : vector<16x128xf32>
    %c0_86 = arith.constant 0 : index
    %c0_87 = arith.constant 0 : index
    %c0_88 = arith.constant 0 : index
    %151 = vector.load %arg15[%c0_86, %c0_87, %c0_88] : memref<1x16x128xf32, #tpu.memory_space<vmem>>, vector<1x16x128xf32>
    %152 = vector.shape_cast %151 : vector<1x16x128xf32> to vector<16x128xf32>
    %153 = vector.shape_cast %150 : vector<16x128xf32> to vector<1x16x128xf32>
    tpu.vector_store %arg15[%c0_86, %c0_87, %c0_88], %153 {strides = array<i32>} : memref<1x16x128xf32, #tpu.memory_space<vmem>>, vector<1x16x128xf32>,
    return
  }
  func.func @transform_0(%arg0: i32) -> (i32, i32, i32) {
    %c0_i32 = arith.constant 0 : i32
    %c0_i32_0 = arith.constant 0 : i32
    %c0_i32_1 = arith.constant 0 : i32
    return %arg0, %c0_i32, %c0_i32_0 : i32, i32, i32
  }
  func.func @transform_1(%arg0: i32) -> (i32, i32) {
    %c0_i32 = arith.constant 0 : i32
    %c0_i32_0 = arith.constant 0 : i32
    %c0_i32_1 = arith.constant 0 : i32
    return %c0_i32, %c0_i32_0 : i32, i32
  }
  func.func @transform_2(%arg0: i32) -> (i32, i32) {
    %c0_i32 = arith.constant 0 : i32
    %c0_i32_0 = arith.constant 0 : i32
    %c0_i32_1 = arith.constant 0 : i32
    return %c0_i32, %c0_i32_0 : i32, i32
  }
  func.func @transform_3(%arg0: i32) -> (i32, i32, i32) {
    %c0_i32 = arith.constant 0 : i32
    %c0_i32_0 = arith.constant 0 : i32
    %c0_i32_1 = arith.constant 0 : i32
    %c0_i32_2 = arith.constant 0 : i32
    return %c0_i32, %c0_i32_0, %c0_i32_1 : i32, i32, i32
  }
  func.func @transform_4(%arg0: i32) -> (i32, i32, i32) {
    %c0_i32 = arith.constant 0 : i32
    %c0_i32_0 = arith.constant 0 : i32
    %c0_i32_1 = arith.constant 0 : i32
    %c0_i32_2 = arith.constant 0 : i32
    return %c0_i32, %c0_i32_0, %c0_i32_1 : i32, i32, i32
  }
  func.func @transform_5(%arg0: i32) -> (i32, i32, i32) {
    %c0_i32 = arith.constant 0 : i32
    %c0_i32_0 = arith.constant 0 : i32
    %c0_i32_1 = arith.constant 0 : i32
    %c0_i32_2 = arith.constant 0 : i32
    return %c0_i32, %c0_i32_0, %c0_i32_1 : i32, i32, i32
  }
  func.func @transform_6(%arg0: i32) -> (i32, i32) {
    %c0_i32 = arith.constant 0 : i32
    %c0_i32_0 = arith.constant 0 : i32
    %c0_i32_1 = arith.constant 0 : i32
    return %c0_i32, %c0_i32_0 : i32, i32
  }
  func.func @transform_7(%arg0: i32) -> (i32, i32) {
    %c0_i32 = arith.constant 0 : i32
    %c0_i32_0 = arith.constant 0 : i32
    %c0_i32_1 = arith.constant 0 : i32
    return %c0_i32, %c0_i32_0 : i32, i32
  }
  func.func @transform_8(%arg0: i32) -> (i32, i32) {
    %c0_i32 = arith.constant 0 : i32
    %c0_i32_0 = arith.constant 0 : i32
    %c0_i32_1 = arith.constant 0 : i32
    return %c0_i32, %c0_i32_0 : i32, i32
  }
  func.func @transform_9(%arg0: i32) -> (i32, i32) {
    %c0_i32 = arith.constant 0 : i32
    %c0_i32_0 = arith.constant 0 : i32
    %c0_i32_1 = arith.constant 0 : i32
    return %c0_i32, %c0_i32_0 : i32, i32
  }
  func.func @transform_10(%arg0: i32) -> (i32, i32) {
    %c0_i32 = arith.constant 0 : i32
    %c0_i32_0 = arith.constant 0 : i32
    %c0_i32_1 = arith.constant 0 : i32
    return %c0_i32, %c0_i32_0 : i32, i32
  }
  func.func @transform_11(%arg0: i32) -> (i32, i32) {
    %c0_i32 = arith.constant 0 : i32
    %c0_i32_0 = arith.constant 0 : i32
    %c0_i32_1 = arith.constant 0 : i32
    return %c0_i32, %c0_i32_0 : i32, i32
  }
  func.func @transform_12(%arg0: i32) -> (i32, i32) {
    %c0_i32 = arith.constant 0 : i32
    %c0_i32_0 = arith.constant 0 : i32
    %c0_i32_1 = arith.constant 0 : i32
    return %c0_i32, %c0_i32_0 : i32, i32
  }
  func.func @transform_13(%arg0: i32) -> (i32, i32) {
    %c0_i32 = arith.constant 0 : i32
    %c0_i32_0 = arith.constant 0 : i32
    %c0_i32_1 = arith.constant 0 : i32
    return %c0_i32, %c0_i32_0 : i32, i32
  }
  func.func @transform_14(%arg0: i32) -> (i32, i32, i32) {
    %c0_i32 = arith.constant 0 : i32
    %c0_i32_0 = arith.constant 0 : i32
    %c0_i32_1 = arith.constant 0 : i32
    return %arg0, %c0_i32, %c0_i32_0 : i32, i32, i32
  }
}

</mosaic_0001>

<bundles_post_ra>
// kernel: tpu_custom_call.1
= control target key start
LH: loop header
LB: loop body
LE: loop exit
PB: predicated region body
PF: predicated region fallthrough
CT: control target
= control target key end

     0   :  { %s5351_s0 = inlined_call_operand.vmem [shape: f32[2,16,128], index: 0, kind: input, shape index: {}]   ;;  %s5352_s1 = inlined_call_operand.vmem [shape: f32[1,128], index: 1, kind: input, shape index: {}]   ;;  %s5353_s2 = inlined_call_operand.vmem [shape: f32[1,128], index: 2, kind: input, shape index: {}]   ;;  %s5354_s3 = inlined_call_operand.vmem [shape: bf16[4,128,32], index: 3, kind: input, shape index: {}]   ;;  %s5355_s4 = inlined_call_operand.vmem [shape: bf16[4,128,32], index: 4, kind: input, shape index: {}]   ;;  %s5356_s5 = inlined_call_operand.vmem [shape: bf16[4,128,32], index: 5, kind: input, shape index: {}]   ;;  %s5357_s6 = inlined_call_operand.vmem [shape: bf16[128,128], index: 6, kind: input, shape index: {}]   ;;  %s5358_s7 = inlined_call_operand.vmem [shape: f32[1,128], index: 7, kind: input, shape index: {}]   ;;  %s5359_s8 = inlined_call_operand.vmem [shape: f32[1,128], index: 8, kind: input, shape index: {}]   ;;  %s5360_s9 = inlined_call_operand.vmem [shape: f32[1,128], index: 9, kind: input, shape index: {}]   ;;  %s5361_s10 = inlined_call_operand.vmem [shape: bf16[128,512], index: 10, kind: input, shape index: {}]   ;;  %s5362_s11 = inlined_call_operand.vmem [shape: f32[1,512], index: 11, kind: input, shape index: {}]   ;;  %s5363_s12 = inlined_call_operand.vmem [shape: bf16[512,128], index: 12, kind: input, shape index: {}]   ;;  %s5364_s13 = inlined_call_operand.vmem [shape: f32[1,128], index: 13, kind: input, shape index: {}]   ;;  %s5365_s14 = inlined_call_operand.hbm [shape: f32[2,16,128], index: 14, kind: output, shape index: {}]  }
   0x1   :  { %5367 = sst [smem:[#allocation7_spill]] %s5351_s0 }
   0x2   :  { %5368 = sst [smem:[#allocation8_spill]] %s5352_s1 }
   0x3   :  { %19 = vsyncpa [#allocation3], 0 }
   0x4   :  { %21 = vsyncpa [#allocation3 + $0x1], 0  ;;  %s4482_s29 = smov 0   ;;  %s4484_s30 = smov 0  }
   0x5   :  { %s4486_s15 = smov 0   ;;  %s4488_s16 = smov 0  }
   0x6 LB: > { %5369 = sst [smem:[#allocation5_spill]] %s4392_s15  ;;  %s4503_s17 = sadd.s32 4294967295, %s4396_s16   ;;  %s4396_s16 = sphi %s4488_s16, %s5379_s16   ;;  %s4392_s15 = sphi %s4486_s15, %s5376_s15   ;;  %s4388_s30 = sphi %s4484_s30, %s5378_s30   ;;  %s4384_s29 = sphi %s4482_s29, %s5377_s29  }
   0x7   : > { %s3207_s18 = sadd.s32 4294967294, %s4396_s16   ;;  %s4507_s19 = sadd.s32 1, %s4396_s16  }
   0x8   : > { %s333_s20 = sadd.s32 1, %s4392_s15  ;;  %s330_s21 = ssub.s32 %s4396_s16, %s4507_s19 }
   0x9   : > { %p343_p0 = scmp.ne.s32.totalorder %s4392_s15, %s4388_s30  ;;  %p331_p1 = scmp.eq.s32.totalorder %s330_s21, 0 }
   0xa   : > { %p344_p2 = scmp.eq.s32.totalorder %s4503_s17, 1  ;;  %p349_p3 = scmp.ne.s32.totalorder %s4388_s30, %s4384_s29 }
   0xb   : > { %p350_p4 = scmp.eq.s32.totalorder %s3207_s18, 1  ;;  %p3210_p7 = scmp.ge.s32.totalorder %s4396_s16, 1 }
   0xc   : > { %s4518_s22 = scalar_select %p331_p1, %s4392_s15, %s333_s20  }
   0xd   : > { %p4520_p5 = por %p344_p2, %p343_p0  ;;  %p4524_p6 = por %p350_p4, %p349_p3 }
   0xe   : > { %5370 = sst [smem:[#allocation6_spill]] %s4518_s22  ;;  %p415_p8 = scmp.lt.s32.totalorder %s4396_s16, 3 }
  0x10   : > { %p416_p9 = pnand %p3210_p7, %p415_p8 }
  0x11   : > { %p461_p10 = scmp.lt.s32.totalorder (!%p416_p9), %s4503_s17, 1  ;;  %s5373_s0 = sld [smem:[#allocation7_spill]] (!%p416_p9) }
  0x12   : > { %419 = sbr.rel (%p416_p9) target bundleno = 2435 (0x983), region = 76  ;;  %s5374_s1 = sld [smem:[#allocation8_spill]] (!%p416_p9) }
  0x13   : > { %s4400_s15 = smov (!%p416_p9), 32   ;;  %s4401_s22 = smov (!%p416_p9), 64  }
  0x14   : > { %s3546_s20 = sshll.u32 (!%p416_p9), %s4503_s17, 8 }
  0x17   : > { %s462_s25 = scalar_select %p461_p10, %s4503_s17, 1  ;;  %v4094_v2 = vld [vmem:[%s5354_s3 + $0x38] sm:$0xff]   ;;  %v4398_v4 = vmov 0.0   ;;  %v4096_v13 = vld [vmem:[%s5354_s3 + $0x30] sm:$0xff]   ;;  %v4098_v15 = vld [vmem:[%s5354_s3 + $0x28] sm:$0xff]   ;;  %vm4399_vm0 = vmmov 0  }
  0x18   : > { %v4095_v3 = vld [vmem:[%s5354_s3 + $0x78] sm:$0xff]   ;;  %3724 = vmatprep.subr.bf16.mxu0 %v4398_v4  ;;  %3744 = vmatprep.subr.bf16.mxu1 %v4398_v4  ;;  %v4097_v14 = vld [vmem:[%s5354_s3 + $0x70] sm:$0xff]   ;;  %v4099_v16 = vld [vmem:[%s5354_s3 + $0x68] sm:$0xff]   ;;  %vm1792_vm1 = vcmask 261120   ;;  %vm1981_vm2 = vcmask 130048   ;;  %vm2276_vm3 = vcmask 523264  }
  0x19   : > { %s3545_s26 = sshll.u32 %s462_s25, 4  ;;  %3725 = vmatpush3.bf16.msra.mxu0 %v4094_v2  ;;  %3745 = vmatpush3.bf16.msra.mxu1 %v4095_v3  ;;  %v4100_v17 = vld [vmem:[%s5354_s3 + $0x20] sm:$0xff]   ;;  %v4102_v19 = vld [vmem:[%s5354_s3 + $0x18] sm:$0xff]   ;;  %v4104_v21 = vld [vmem:[%s5354_s3 + $0x10] sm:$0xff]   ;;  %s4402_s25 = smov 96   ;;  %vm2279_vm4 = vcmask 785408  }
  0x1a   : > { %s4535_s18 = scalar_lea.vmem %s5373_s0, %s3545_s26  ;;  %3726 = vmatprep.subr.bf16.mxu0 %v4398_v4  ;;  %3746 = vmatprep.subr.bf16.mxu1 %v4398_v4  ;;  %v4101_v18 = vld [vmem:[%s5354_s3 + $0x60] sm:$0xff]   ;;  %v4103_v20 = vld [vmem:[%s5354_s3 + $0x58] sm:$0xff]   ;;  %v4105_v22 = vld [vmem:[%s5354_s3 + $0x50] sm:$0xff]   ;;  %s458_s0 = sand.u32 1, %s4388_s30  }
  0x1b   : > { %v467_v0 = vld [vmem:[%s4535_s18] sm:$0xff]  ;;  %v468_v1 = vld [vmem:[%s4535_s18 + $0x8] sm:$0xff]  ;;  %3740 = vmatprep.mubr.msk.bf16.mxu0 %vm4399_vm0, %v4398_v4  ;;  %3760 = vmatprep.mubr.msk.bf16.mxu1 %vm4399_vm0, %v4398_v4  ;;  %v4110_v43 = vld [vmem:[%s5354_s3 + $0xb8] sm:$0xff]   ;;  %s3211_s27 = sshll.u32 %s458_s0, 4  ;;  %s4404_s17 = smov [#allocation2]  }
  0x1c   : > { %471 = vadd.xlane.f32.xlu0 %v467_v0  ;;  %v4106_v23 = vld [vmem:[%s5354_s3 + $0x8] sm:$0xff]   ;;  %v4108_v25 = vld [vmem:[%s5354_s3] sm:$0xff]   ;;  %v4111_v44 = vld [vmem:[%s5354_s3 + $0xf8] sm:$0xff]   ;;  %s4340_s26 = sshll.u32 %s4404_s17, 4  ;;  %s4341_s26 = int_to_ptr.vmem [resolvable:$false] %s4340_s26 }
  0x1d   : > { %3727 = vmatpush3.bf16.msra.mxu0 %v4096_v13  ;;  %3747 = vmatpush3.bf16.msra.mxu1 %v4097_v14  ;;  %v4107_v24 = vld [vmem:[%s5354_s3 + $0x48] sm:$0xff]   ;;  %v4109_v26 = vld [vmem:[%s5354_s3 + $0x40] sm:$0xff]   ;;  %v4112_v46 = vld [vmem:[%s5354_s3 + $0xb0] sm:$0xff]  }
  0x1e   : > { %3728 = vmatprep.subr.bf16.mxu0 %v4398_v4  ;;  %3748 = vmatprep.subr.bf16.mxu1 %v4398_v4  ;;  %v3214_v35 = vld [vmem:[%s5374_s1] ss:$0 sm:$0xff]  ;;  %v4113_v47 = vld [vmem:[%s5354_s3 + $0xf0] sm:$0xff]   ;;  %v4114_v48 = vld [vmem:[%s5354_s3 + $0xa8] sm:$0xff]  }
  0x1f   : > { %v3215_v39 = vld [vmem:[%s5353_s2] ss:$0 sm:$0xff]  ;;  %v4115_v49 = vld [vmem:[%s5354_s3 + $0xe8] sm:$0xff]   ;;  %v4118_v52 = vld [vmem:[%s5354_s3 + $0x98] sm:$0xff]  }
  0x20   : > { %473 = vadd.xlane.f32.xlu0 %v468_v1  ;;  %v4116_v50 = vld [vmem:[%s5354_s3 + $0xa0] sm:$0xff]   ;;  %v4119_v53 = vld [vmem:[%s5354_s3 + $0xd8] sm:$0xff]   ;;  %v4120_v54 = vld [vmem:[%s5354_s3 + $0x90] sm:$0xff]  }
  0x21   : > { %3729 = vmatpush3.bf16.msra.mxu0 %v4098_v15  ;;  %3749 = vmatpush3.bf16.msra.mxu1 %v4099_v16  ;;  %v4117_v51 = vld [vmem:[%s5354_s3 + $0xe0] sm:$0xff]   ;;  %v4121_v55 = vld [vmem:[%s5354_s3 + $0xd0] sm:$0xff]   ;;  %v4122_v56 = vld [vmem:[%s5354_s3 + $0x88] sm:$0xff]  }
  0x22   : > { %3730 = vmatprep.subr.bf16.mxu0 %v4398_v4  ;;  %3750 = vmatprep.subr.bf16.mxu1 %v4398_v4  ;;  %v4123_v57 = vld [vmem:[%s5354_s3 + $0xc8] sm:$0xff]   ;;  %v4124_v58 = vld [vmem:[%s5354_s3 + $0x80] sm:$0xff]   ;;  %v4126_v60 = vld [vmem:[%s5355_s4 + $0x38] sm:$0xff]  }
  0x23   : > { %v4125_v59 = vld [vmem:[%s5354_s3 + $0xc0] sm:$0xff]   ;;  %v4127_v61 = vld [vmem:[%s5355_s4 + $0x78] sm:$0xff]   ;;  %v4128_v62 = vld [vmem:[%s5355_s4 + $0x30] sm:$0xff]  }
  0x24   : > { %v4129_v63 = vld [vmem:[%s5355_s4 + $0x70] sm:$0xff]   ;;  %v4132_v2 = vld [vmem:[%s5355_s4 + $0x20] sm:$0xff]   ;;  %v4142_v13 = vld [vmem:[%s5355_s4 + $0xb8] sm:$0xff]  }
  0x25   : > { %3731 = vmatpush3.bf16.msra.mxu0 %v4100_v17  ;;  %3751 = vmatpush3.bf16.msra.mxu1 %v4101_v18  ;;  %v4133_v3 = vld [vmem:[%s5355_s4 + $0x60] sm:$0xff]   ;;  %v4143_v14 = vld [vmem:[%s5355_s4 + $0xf8] sm:$0xff]   ;;  %v4144_v15 = vld [vmem:[%s5355_s4 + $0xb0] sm:$0xff]  }
  0x26   : > { %3732 = vmatprep.subr.bf16.mxu0 %v4398_v4  ;;  %3752 = vmatprep.subr.bf16.mxu1 %v4398_v4  ;;  %v4145_v16 = vld [vmem:[%s5355_s4 + $0xf0] sm:$0xff]   ;;  %v4146_v17 = vld [vmem:[%s5355_s4 + $0xa8] sm:$0xff]  }
  0x27   : > { %v4147_v18 = vld [vmem:[%s5355_s4 + $0xe8] sm:$0xff]  }
  0x29   : > { %3733 = vmatpush3.bf16.msra.mxu0 %v4102_v19  ;;  %3753 = vmatpush3.bf16.msra.mxu1 %v4103_v20  ;;  %v4148_v19 = vld [vmem:[%s5355_s4 + $0xa0] sm:$0xff]  }
  0x2a   : > { %3734 = vmatprep.subr.bf16.mxu0 %v4398_v4  ;;  %3754 = vmatprep.subr.bf16.mxu1 %v4398_v4  ;;  %v4149_v20 = vld [vmem:[%s5355_s4 + $0xe0] sm:$0xff]  }
  0x2d   : > { %3735 = vmatpush3.bf16.msra.mxu0 %v4104_v21  ;;  %3755 = vmatpush3.bf16.msra.mxu1 %v4105_v22  ;;  %v4150_v21 = vld [vmem:[%s5355_s4 + $0x98] sm:$0xff]  }
  0x2e   : > { %3736 = vmatprep.subr.bf16.mxu0 %v4398_v4  ;;  %3756 = vmatprep.subr.bf16.mxu1 %v4398_v4  ;;  %v4151_v22 = vld [vmem:[%s5355_s4 + $0xd8] sm:$0xff]  }
  0x31   : > { %3737 = vmatpush3.bf16.msra.mxu0 %v4106_v23  ;;  %3757 = vmatpush3.bf16.msra.mxu1 %v4107_v24  ;;  %v4152_v23 = vld [vmem:[%s5355_s4 + $0x90] sm:$0xff]  }
  0x32   : > { %3738 = vmatprep.subr.bf16.mxu0 %v4398_v4  ;;  %3758 = vmatprep.subr.bf16.mxu1 %v4398_v4  ;;  %v4153_v24 = vld [vmem:[%s5355_s4 + $0xd0] sm:$0xff]  }
  0x35   : > { %3739 = vmatpush3.bf16.msra.mxu0 %v4108_v25  ;;  %3759 = vmatpush3.bf16.msra.mxu1 %v4109_v26  ;;  %v4154_v25 = vld [vmem:[%s5355_s4 + $0x88] sm:$0xff]  }
  0x36   : > { %3764 = vmatprep.subr.bf16.mxu0 %v4398_v4  ;;  %3784 = vmatprep.subr.bf16.mxu1 %v4398_v4  ;;  %v4155_v26 = vld [vmem:[%s5355_s4 + $0xc8] sm:$0xff]  }
  0xa5   : > { %v472_v5 = vpop.xlane.xlu0 %471 }
  0xa6   : > { %v476_v6 = vmul.f32 0.0078125, %v472_v5  ;;  %v4134_v5 = vld [vmem:[%s5355_s4 + $0x18] sm:$0xff]  }
  0xa8   : > { %v478_v7 = vsub.f32 %v467_v0, %v476_v6  ;;  %v4130_v0 = vld [vmem:[%s5355_s4 + $0x28] sm:$0xff]   ;;  %v4135_v6 = vld [vmem:[%s5355_s4 + $0x58] sm:$0xff]  }
  0xa9   : > { %v474_v8 = vpop.xlane.xlu0 %473 }
  0xaa   : > { %v477_v9 = vmul.f32 0.0078125, %v474_v8  ;;  %v480_v10 = vmul.f32 %v478_v7, %v478_v7  ;;  %v4137_v8 = vld [vmem:[%s5355_s4 + $0x50] sm:$0xff]  }
  0xac   : > { %v479_v11 = vsub.f32 %v468_v1, %v477_v9  ;;  %482 = vadd.xlane.f32.xlu1 %v480_v10  ;;  %v4131_v1 = vld [vmem:[%s5355_s4 + $0x68] sm:$0xff]  }
  0xad   : > { %v4138_v9 = vld [vmem:[%s5355_s4 + $0x8] sm:$0xff]  }
  0xae   : > { %v481_v12 = vmul.f32 %v479_v11, %v479_v11  ;;  %v4139_v10 = vld [vmem:[%s5355_s4 + $0x48] sm:$0xff]  }
  0xb0   : > { %484 = vadd.xlane.f32.xlu1 %v481_v12  ;;  %v4141_v12 = vld [vmem:[%s5355_s4 + $0x40] sm:$0xff]  }
 0x135   : > { %v483_v27 = vpop.xlane.xlu1 %482 }
 0x136   : > { %v486_v28 = vmul.f32 0.0078125, %v483_v27  ;;  %v4156_v27 = vld [vmem:[%s5355_s4 + $0x80] sm:$0xff]  }
 0x138   : > { %v488_v29 = vadd.f32 1e-05, %v486_v28  ;;  %v4157_v28 = vld [vmem:[%s5355_s4 + $0xc0] sm:$0xff]  }
 0x139   : > { %v485_v30 = vpop.xlane.xlu1 %484 }
 0x13a   : > { %4278 = vrsqrt.f32 %v488_v29  ;;  %v487_v31 = vmul.f32 0.0078125, %v485_v30  ;;  %v4158_v29 = vld [vmem:[%s5356_s5 + $0x38] sm:$0xff]  }
 0x13b   : > { %v4159_v30 = vld [vmem:[%s5356_s5 + $0x78] sm:$0xff]  }
 0x13c   : > { %v489_v32 = vadd.f32 1e-05, %v487_v31  ;;  %v4160_v31 = vld [vmem:[%s5356_s5 + $0x30] sm:$0xff]  }
 0x13e   : > { %4280 = vrsqrt.f32 %v489_v32  ;;  %v4161_v32 = vld [vmem:[%s5356_s5 + $0x70] sm:$0xff]  }
 0x147   : > { %v4279_v33 = vpop.eup %4278 }
 0x148   : > { %v492_v34 = vmul.f32 %v4279_v33, %v478_v7  ;;  %v4136_v7 = vld [vmem:[%s5355_s4 + $0x10] sm:$0xff]   ;;  %v4162_v33 = vld [vmem:[%s5356_s5 + $0x28] sm:$0xff]  }
 0x14a   : > { %v500_v37 = vmul.f32 %v3214_v35, %v492_v34  ;;  %v4163_v34 = vld [vmem:[%s5356_s5 + $0x68] sm:$0xff]  }
 0x14b   : > { %v4281_v36 = vpop.eup %4280 }
 0x14c   : > { %v493_v38 = vmul.f32 %v4281_v36, %v479_v11  ;;  %v508_v41 = vadd.f32 %v3215_v39, %v500_v37  ;;  %v4140_v11 = vld [vmem:[%s5355_s4] sm:$0xff]   ;;  %v4166_v37 = vld [vmem:[%s5356_s5 + $0x18] sm:$0xff]  }
 0x14d   : > { %v4165_v36 = vld [vmem:[%s5356_s5 + $0x60] sm:$0xff]  }
 0x14e   : > { %v501_v40 = vmul.f32 %v3214_v35, %v493_v38  ;;  %v4164_v35 = vld [vmem:[%s5356_s5 + $0x20] sm:$0xff]   ;;  %v4167_v38 = vld [vmem:[%s5356_s5 + $0x58] sm:$0xff]  }
 0x150   : > { %v509_v42 = vadd.f32 %v3215_v39, %v501_v40  ;;  %v4168_v39 = vld [vmem:[%s5356_s5 + $0x10] sm:$0xff]  }
 0x151   : > { %v4169_v40 = vld [vmem:[%s5356_s5 + $0x50] sm:$0xff]  }
 0x152   : > { %v4621_v45 = vpack.c.bf16 %v509_v42, %v508_v41  ;;  %v4170_v41 = vld [vmem:[%s5356_s5 + $0x8] sm:$0xff]  }
 0x153   : > { %v4171_v42 = vld [vmem:[%s5356_s5 + $0x48] sm:$0xff]  }
 0x154   : > { %3741 = vmatmul.mubr.bf16.vlgmr.msra.gmra.mxu0 %v4621_v45  ;;  %3761 = vmatmul.mubr.bf16.vlgmr.msra.gmra.mxu1 %v4621_v45 }
 0x155   : > { %3765 = vmatpush3.bf16.msra.mxu0 %v4110_v43  ;;  %3785 = vmatpush3.bf16.msra.mxu1 %v4111_v44  ;;  %v4172_v43 = vld [vmem:[%s5356_s5] sm:$0xff]  }
 0x156   : > { %3766 = vmatprep.subr.bf16.mxu0 %v4398_v4  ;;  %3786 = vmatprep.subr.bf16.mxu1 %v4398_v4  ;;  %v4173_v44 = vld [vmem:[%s5356_s5 + $0x40] sm:$0xff]  }
 0x157   : > { %3780 = vmatprep.mubr.msk.bf16.mxu0 %vm4399_vm0, %v4398_v4  ;;  %3800 = vmatprep.mubr.msk.bf16.mxu1 %vm4399_vm0, %v4398_v4 }
 0x159   : > { %3767 = vmatpush3.bf16.msra.mxu0 %v4112_v46  ;;  %3787 = vmatpush3.bf16.msra.mxu1 %v4113_v47  ;;  %v4174_v46 = vld [vmem:[%s5356_s5 + $0xb8] sm:$0xff]  }
 0x15a   : > { %3768 = vmatprep.subr.bf16.mxu0 %v4398_v4  ;;  %3788 = vmatprep.subr.bf16.mxu1 %v4398_v4  ;;  %v4175_v47 = vld [vmem:[%s5356_s5 + $0xf8] sm:$0xff]  }
 0x15d   : > { %3769 = vmatpush3.bf16.msra.mxu0 %v4114_v48  ;;  %3789 = vmatpush3.bf16.msra.mxu1 %v4115_v49  ;;  %v4176_v48 = vld [vmem:[%s5356_s5 + $0xb0] sm:$0xff]  }
 0x15e   : > { %3770 = vmatprep.subr.bf16.mxu0 %v4398_v4  ;;  %3790 = vmatprep.subr.bf16.mxu1 %v4398_v4  ;;  %v4177_v49 = vld [vmem:[%s5356_s5 + $0xf0] sm:$0xff]  }
 0x161   : > { %3771 = vmatpush3.bf16.msra.mxu0 %v4116_v50  ;;  %3791 = vmatpush3.bf16.msra.mxu1 %v4117_v51  ;;  %v4178_v50 = vld [vmem:[%s5356_s5 + $0xa8] sm:$0xff]  }
 0x162   : > { %3772 = vmatprep.subr.bf16.mxu0 %v4398_v4  ;;  %3792 = vmatprep.subr.bf16.mxu1 %v4398_v4  ;;  %v4179_v51 = vld [vmem:[%s5356_s5 + $0xe8] sm:$0xff]  }
 0x165   : > { %3773 = vmatpush3.bf16.msra.mxu0 %v4118_v52  ;;  %3793 = vmatpush3.bf16.msra.mxu1 %v4119_v53  ;;  %v4180_v52 = vld [vmem:[%s5356_s5 + $0xa0] sm:$0xff]  }
 0x166   : > { %3774 = vmatprep.subr.bf16.mxu0 %v4398_v4  ;;  %3794 = vmatprep.subr.bf16.mxu1 %v4398_v4  ;;  %v4181_v53 = vld [vmem:[%s5356_s5 + $0xe0] sm:$0xff]  }
 0x169   : > { %3775 = vmatpush3.bf16.msra.mxu0 %v4120_v54  ;;  %3795 = vmatpush3.bf16.msra.mxu1 %v4121_v55  ;;  %v4182_v54 = vld [vmem:[%s5356_s5 + $0x98] sm:$0xff]  }
 0x16a   : > { %3776 = vmatprep.subr.bf16.mxu0 %v4398_v4  ;;  %3796 = vmatprep.subr.bf16.mxu1 %v4398_v4  ;;  %v4183_v55 = vld [vmem:[%s5356_s5 + $0xd8] sm:$0xff]  }
 0x16d   : > { %3777 = vmatpush3.bf16.msra.mxu0 %v4122_v56  ;;  %3797 = vmatpush3.bf16.msra.mxu1 %v4123_v57  ;;  %v4184_v56 = vld [vmem:[%s5356_s5 + $0x90] sm:$0xff]  }
 0x16e   : > { %3778 = vmatprep.subr.bf16.mxu0 %v4398_v4  ;;  %3798 = vmatprep.subr.bf16.mxu1 %v4398_v4  ;;  %v4185_v57 = vld [vmem:[%s5356_s5 + $0xd0] sm:$0xff]  }
 0x171   : > { %3779 = vmatpush3.bf16.msra.mxu0 %v4124_v58  ;;  %3799 = vmatpush3.bf16.msra.mxu1 %v4125_v59  ;;  %v4186_v58 = vld [vmem:[%s5356_s5 + $0x88] sm:$0xff]  }
 0x172   : > { %3804 = vmatprep.subr.bf16.mxu0 %v4398_v4  ;;  %3824 = vmatprep.subr.bf16.mxu1 %v4398_v4  ;;  %v4187_v59 = vld [vmem:[%s5356_s5 + $0xc8] sm:$0xff]  }
 0x174   : > { %3781 = vmatmul.mubr.bf16.vlgmr.msra.gmra.mxu0 %v4621_v45  ;;  %3801 = vmatmul.mubr.bf16.vlgmr.msra.gmra.mxu1 %v4621_v45 }
 0x175   : > { %3805 = vmatpush3.bf16.msra.mxu0 %v4126_v60  ;;  %3825 = vmatpush3.bf16.msra.mxu1 %v4127_v61  ;;  %v4188_v60 = vld [vmem:[%s5356_s5 + $0x80] sm:$0xff]  }
 0x176   : > { %3806 = vmatprep.subr.bf16.mxu0 %v4398_v4  ;;  %3826 = vmatprep.subr.bf16.mxu1 %v4398_v4  ;;  %v4189_v61 = vld [vmem:[%s5356_s5 + $0xc0] sm:$0xff]  }
 0x177   : > { %3820 = vmatprep.mubr.msk.bf16.mxu0 %vm4399_vm0, %v4398_v4  ;;  %3840 = vmatprep.mubr.msk.bf16.mxu1 %vm4399_vm0, %v4398_v4 }
 0x179   : > { %3807 = vmatpush3.bf16.msra.mxu0 %v4128_v62  ;;  %3827 = vmatpush3.bf16.msra.mxu1 %v4129_v63 }
 0x17a   : > { %3808 = vmatprep.subr.bf16.mxu0 %v4398_v4  ;;  %3828 = vmatprep.subr.bf16.mxu1 %v4398_v4 }
 0x17d   : > { %3809 = vmatpush3.bf16.msra.mxu0 %v4130_v0  ;;  %3829 = vmatpush3.bf16.msra.mxu1 %v4131_v1 }
 0x17e   : > { %3810 = vmatprep.subr.bf16.mxu0 %v4398_v4  ;;  %3830 = vmatprep.subr.bf16.mxu1 %v4398_v4 }
 0x181   : > { %3811 = vmatpush3.bf16.msra.mxu0 %v4132_v2  ;;  %3831 = vmatpush3.bf16.msra.mxu1 %v4133_v3 }
 0x182   : > { %3812 = vmatprep.subr.bf16.mxu0 %v4398_v4  ;;  %3832 = vmatprep.subr.bf16.mxu1 %v4398_v4 }
 0x185   : > { %3813 = vmatpush3.bf16.msra.mxu0 %v4134_v5  ;;  %3833 = vmatpush3.bf16.msra.mxu1 %v4135_v6 }
 0x186   : > { %3814 = vmatprep.subr.bf16.mxu0 %v4398_v4  ;;  %3834 = vmatprep.subr.bf16.mxu1 %v4398_v4 }
 0x189   : > { %3815 = vmatpush3.bf16.msra.mxu0 %v4136_v7  ;;  %3835 = vmatpush3.bf16.msra.mxu1 %v4137_v8 }
 0x18a   : > { %3816 = vmatprep.subr.bf16.mxu0 %v4398_v4  ;;  %3836 = vmatprep.subr.bf16.mxu1 %v4398_v4 }
 0x18d   : > { %3817 = vmatpush3.bf16.msra.mxu0 %v4138_v9  ;;  %3837 = vmatpush3.bf16.msra.mxu1 %v4139_v10 }
 0x18e   : > { %3818 = vmatprep.subr.bf16.mxu0 %v4398_v4  ;;  %3838 = vmatprep.subr.bf16.mxu1 %v4398_v4 }
 0x191   : > { %3819 = vmatpush3.bf16.msra.mxu0 %v4140_v11  ;;  %3839 = vmatpush3.bf16.msra.mxu1 %v4141_v12 }
 0x192   : > { %3844 = vmatprep.subr.bf16.mxu0 %v4398_v4  ;;  %3864 = vmatprep.subr.bf16.mxu1 %v4398_v4 }
 0x194   : > { %3821 = vmatmul.mubr.bf16.vlgmr.msra.gmra.mxu0 %v4621_v45  ;;  %3841 = vmatmul.mubr.bf16.vlgmr.msra.gmra.mxu1 %v4621_v45 }
 0x195   : > { %3845 = vmatpush3.bf16.msra.mxu0 %v4142_v13  ;;  %3865 = vmatpush3.bf16.msra.mxu1 %v4143_v14 }
 0x196   : > { %3846 = vmatprep.subr.bf16.mxu0 %v4398_v4  ;;  %3866 = vmatprep.subr.bf16.mxu1 %v4398_v4 }
 0x197   : > { %3860 = vmatprep.mubr.msk.bf16.mxu0 %vm4399_vm0, %v4398_v4  ;;  %3880 = vmatprep.mubr.msk.bf16.mxu1 %vm4399_vm0, %v4398_v4 }
 0x199   : > { %3847 = vmatpush3.bf16.msra.mxu0 %v4144_v15  ;;  %3867 = vmatpush3.bf16.msra.mxu1 %v4145_v16 }
 0x19a   : > { %3848 = vmatprep.subr.bf16.mxu0 %v4398_v4  ;;  %3868 = vmatprep.subr.bf16.mxu1 %v4398_v4 }
 0x19d   : > { %3849 = vmatpush3.bf16.msra.mxu0 %v4146_v17  ;;  %3869 = vmatpush3.bf16.msra.mxu1 %v4147_v18 }
 0x19e   : > { %3850 = vmatprep.subr.bf16.mxu0 %v4398_v4  ;;  %3870 = vmatprep.subr.bf16.mxu1 %v4398_v4 }
 0x1a1   : > { %3851 = vmatpush3.bf16.msra.mxu0 %v4148_v19  ;;  %3871 = vmatpush3.bf16.msra.mxu1 %v4149_v20 }
 0x1a2   : > { %3852 = vmatprep.subr.bf16.mxu0 %v4398_v4  ;;  %3872 = vmatprep.subr.bf16.mxu1 %v4398_v4 }
 0x1a5   : > { %3853 = vmatpush3.bf16.msra.mxu0 %v4150_v21  ;;  %3873 = vmatpush3.bf16.msra.mxu1 %v4151_v22 }
 0x1a6   : > { %3854 = vmatprep.subr.bf16.mxu0 %v4398_v4  ;;  %3874 = vmatprep.subr.bf16.mxu1 %v4398_v4 }
 0x1a9   : > { %3855 = vmatpush3.bf16.msra.mxu0 %v4152_v23  ;;  %3875 = vmatpush3.bf16.msra.mxu1 %v4153_v24 }
 0x1aa   : > { %3856 = vmatprep.subr.bf16.mxu0 %v4398_v4  ;;  %3876 = vmatprep.subr.bf16.mxu1 %v4398_v4 }
 0x1ad   : > { %3857 = vmatpush3.bf16.msra.mxu0 %v4154_v25  ;;  %3877 = vmatpush3.bf16.msra.mxu1 %v4155_v26 }
 0x1ae   : > { %3858 = vmatprep.subr.bf16.mxu0 %v4398_v4  ;;  %3878 = vmatprep.subr.bf16.mxu1 %v4398_v4 }
 0x1b1   : > { %3859 = vmatpush3.bf16.msra.mxu0 %v4156_v27  ;;  %3879 = vmatpush3.bf16.msra.mxu1 %v4157_v28 }
 0x1b2   : > { %3884 = vmatprep.subr.bf16.mxu0 %v4398_v4  ;;  %3904 = vmatprep.subr.bf16.mxu1 %v4398_v4 }
 0x1b4   : > { %3861 = vmatmul.mubr.bf16.vlgmr.msra.gmra.mxu0 %v4621_v45  ;;  %3881 = vmatmul.mubr.bf16.vlgmr.msra.gmra.mxu1 %v4621_v45 }
 0x1b5   : > { %3885 = vmatpush3.bf16.msra.mxu0 %v4158_v29  ;;  %3905 = vmatpush3.bf16.msra.mxu1 %v4159_v30 }
 0x1b6   : > { %3886 = vmatprep.subr.bf16.mxu0 %v4398_v4  ;;  %3906 = vmatprep.subr.bf16.mxu1 %v4398_v4 }
 0x1b7   : > { %3900 = vmatprep.mubr.msk.bf16.mxu0 %vm4399_vm0, %v4398_v4  ;;  %3920 = vmatprep.mubr.msk.bf16.mxu1 %vm4399_vm0, %v4398_v4 }
 0x1b9   : > { %3887 = vmatpush3.bf16.msra.mxu0 %v4160_v31  ;;  %3907 = vmatpush3.bf16.msra.mxu1 %v4161_v32 }
 0x1ba   : > { %3888 = vmatprep.subr.bf16.mxu0 %v4398_v4  ;;  %3908 = vmatprep.subr.bf16.mxu1 %v4398_v4 }
 0x1bd   : > { %3889 = vmatpush3.bf16.msra.mxu0 %v4162_v33  ;;  %3909 = vmatpush3.bf16.msra.mxu1 %v4163_v34 }
 0x1be   : > { %3890 = vmatprep.subr.bf16.mxu0 %v4398_v4  ;;  %3910 = vmatprep.subr.bf16.mxu1 %v4398_v4 }
 0x1c1   : > { %3891 = vmatpush3.bf16.msra.mxu0 %v4164_v35  ;;  %3911 = vmatpush3.bf16.msra.mxu1 %v4165_v36 }
 0x1c2   : > { %3892 = vmatprep.subr.bf16.mxu0 %v4398_v4  ;;  %3912 = vmatprep.subr.bf16.mxu1 %v4398_v4 }
 0x1c5   : > { %3893 = vmatpush3.bf16.msra.mxu0 %v4166_v37  ;;  %3913 = vmatpush3.bf16.msra.mxu1 %v4167_v38 }
 0x1c6   : > { %3894 = vmatprep.subr.bf16.mxu0 %v4398_v4  ;;  %3914 = vmatprep.subr.bf16.mxu1 %v4398_v4 }
 0x1c9   : > { %3895 = vmatpush3.bf16.msra.mxu0 %v4168_v39  ;;  %3915 = vmatpush3.bf16.msra.mxu1 %v4169_v40 }
 0x1ca   : > { %3896 = vmatprep.subr.bf16.mxu0 %v4398_v4  ;;  %3916 = vmatprep.subr.bf16.mxu1 %v4398_v4 }
 0x1cd   : > { %3897 = vmatpush3.bf16.msra.mxu0 %v4170_v41  ;;  %3917 = vmatpush3.bf16.msra.mxu1 %v4171_v42 }
 0x1ce   : > { %3898 = vmatprep.subr.bf16.mxu0 %v4398_v4  ;;  %3918 = vmatprep.subr.bf16.mxu1 %v4398_v4 }
 0x1d1   : > { %3899 = vmatpush3.bf16.msra.mxu0 %v4172_v43  ;;  %3919 = vmatpush3.bf16.msra.mxu1 %v4173_v44 }
 0x1d2   : > { %3924 = vmatprep.subr.bf16.mxu0 %v4398_v4  ;;  %3944 = vmatprep.subr.bf16.mxu1 %v4398_v4 }
 0x1d4   : > { %3901 = vmatmul.mubr.bf16.vlgmr.msra.gmra.mxu0 %v4621_v45  ;;  %3921 = vmatmul.mubr.bf16.vlgmr.msra.gmra.mxu1 %v4621_v45 }
 0x1d5   : > { %3925 = vmatpush3.bf16.msra.mxu0 %v4174_v46  ;;  %3945 = vmatpush3.bf16.msra.mxu1 %v4175_v47 }
 0x1d6   : > { %3926 = vmatprep.subr.bf16.mxu0 %v4398_v4  ;;  %3946 = vmatprep.subr.bf16.mxu1 %v4398_v4 }
 0x1d7   : > { %3940 = vmatprep.mubr.msk.bf16.mxu0 %vm4399_vm0, %v4398_v4  ;;  %3960 = vmatprep.mubr.msk.bf16.mxu1 %vm4399_vm0, %v4398_v4 }
 0x1d9   : > { %3927 = vmatpush3.bf16.msra.mxu0 %v4176_v48  ;;  %3947 = vmatpush3.bf16.msra.mxu1 %v4177_v49 }
 0x1da   : > { %3928 = vmatprep.subr.bf16.mxu0 %v4398_v4  ;;  %3948 = vmatprep.subr.bf16.mxu1 %v4398_v4 }
 0x1dd   : > { %3929 = vmatpush3.bf16.msra.mxu0 %v4178_v50  ;;  %3949 = vmatpush3.bf16.msra.mxu1 %v4179_v51 }
 0x1de   : > { %3930 = vmatprep.subr.bf16.mxu0 %v4398_v4  ;;  %3950 = vmatprep.subr.bf16.mxu1 %v4398_v4 }
 0x1e1   : > { %3931 = vmatpush3.bf16.msra.mxu0 %v4180_v52  ;;  %3951 = vmatpush3.bf16.msra.mxu1 %v4181_v53 }
 0x1e2   : > { %3932 = vmatprep.subr.bf16.mxu0 %v4398_v4  ;;  %3952 = vmatprep.subr.bf16.mxu1 %v4398_v4 }
 0x1e5   : > { %3933 = vmatpush3.bf16.msra.mxu0 %v4182_v54  ;;  %3953 = vmatpush3.bf16.msra.mxu1 %v4183_v55 }
 0x1e6   : > { %3934 = vmatprep.subr.bf16.mxu0 %v4398_v4  ;;  %3954 = vmatprep.subr.bf16.mxu1 %v4398_v4 }
 0x1e9   : > { %3935 = vmatpush3.bf16.msra.mxu0 %v4184_v56  ;;  %3955 = vmatpush3.bf16.msra.mxu1 %v4185_v57 }
 0x1ea   : > { %3936 = vmatprep.subr.bf16.mxu0 %v4398_v4  ;;  %3956 = vmatprep.subr.bf16.mxu1 %v4398_v4 }
 0x1ed   : > { %3937 = vmatpush3.bf16.msra.mxu0 %v4186_v58  ;;  %3957 = vmatpush3.bf16.msra.mxu1 %v4187_v59 }
 0x1ee   : > { %3938 = vmatprep.subr.bf16.mxu0 %v4398_v4  ;;  %3958 = vmatprep.subr.bf16.mxu1 %v4398_v4 }
 0x1f1   : > { %3939 = vmatpush3.bf16.msra.mxu0 %v4188_v60  ;;  %3959 = vmatpush3.bf16.msra.mxu1 %v4189_v61 }
 0x1f2   : > { %3964 = vmatprep.subr.bf16.mxu1 %v4398_v4  ;;  %3988 = vmatprep.subr.bf16.mxu0 %v4398_v4 }
 0x1f4   : > { %3941 = vmatmul.mubr.bf16.vlgmr.msra.gmra.mxu0 %v4621_v45  ;;  %3961 = vmatmul.mubr.bf16.vlgmr.msra.gmra.mxu1 %v4621_v45 }
 0x1f5   : > { %3966 = vmatprep.mubr.msk.bf16.mxu1 %vm4399_vm0, %v4398_v4  ;;  %3990 = vmatprep.mubr.msk.bf16.mxu0 %vm4399_vm0, %v4398_v4 }
 0x214   : > { %v609_v62 = vpop.f32.mrf.mxu0  ;;  %v715_v63 = vpop.f32.mrf.mxu1 }
 0x216   : > { %v3742_v0 = vpop.f32.mrf.mxu0  ;;  %v3762_v1 = vpop.f32.mrf.mxu1 }
 0x218   : > { %v612_v2 = vpop.f32.mrf.mxu0  ;;  %v718_v3 = vpop.f32.mrf.mxu1 }
 0x219   : > { %v934_v5 = vpack.c.bf16 %v612_v2, %v609_v62  ;;  %v935_v6 = vpack.c.bf16 %v718_v3, %v715_v63 }
 0x21a   : > { %v3743_v7 = vpop.f32.mrf.mxu0  ;;  %v3763_v8 = vpop.f32.mrf.mxu1 }
 0x234   : > { %v821_v9 = vpop.f32.mrf.mxu0  ;;  %v927_v10 = vpop.f32.mrf.mxu1 }
 0x236   : > { %v3782_v11 = vpop.f32.mrf.mxu0  ;;  %v3802_v45 = vpop.f32.mrf.mxu1 }
 0x238   : > { %v824_v12 = vpop.f32.mrf.mxu0  ;;  %v930_v13 = vpop.f32.mrf.mxu1 }
 0x239   : > { %v936_v14 = vpack.c.bf16 %v824_v12, %v821_v9  ;;  %v937_v15 = vpack.c.bf16 %v930_v13, %v927_v10 }
 0x23a   : > { %v3783_v16 = vpop.f32.mrf.mxu0  ;;  %v3803_v17 = vpop.f32.mrf.mxu1 }
 0x254   : > { %v1036_v18 = vpop.f32.mrf.mxu0  ;;  %v1142_v19 = vpop.f32.mrf.mxu1 }
 0x256   : > { %v3822_v20 = vpop.f32.mrf.mxu0  ;;  %v3842_v21 = vpop.f32.mrf.mxu1 }
 0x258   : > { %v1039_v22 = vpop.f32.mrf.mxu0  ;;  %v1145_v23 = vpop.f32.mrf.mxu1 }
 0x259   : > { %v1361_v24 = vpack.c.bf16 %v1039_v22, %v1036_v18  ;;  %v1362_v28 = vpack.c.bf16 %v1145_v23, %v1142_v19 }
 0x25a   : > { %v3823_v25 = vpop.f32.mrf.mxu0  ;;  %v3843_v26 = vpop.f32.mrf.mxu1 }
 0x25b   : > { %v1797_v27 = vsel %vm1792_vm1, %v1361_v24, 0  ;;  %v1844_v29 = vsel %vm1792_vm1, %v1362_v28, 0 }
 0x25c   : > { %3965 = vmatpush3.bf16.xpose.msra.mxu1 %v1797_v27 }
 0x25d   : > { %3970 = vmatprep.subr.bf16.mxu1 %v4398_v4 }
 0x263   : > { %3967 = vmatmul.mubr.msk.bf16.vlgmr.msra.gmra.mxu1 %vm1792_vm1, %v934_v5 }
 0x264   : > { %3971 = vmatpush3.bf16.xpose.msra.mxu1 %v1844_v29  ;;  %3972 = vmatprep.mubr.msk.bf16.mxu1 %vm4399_vm0, %v4398_v4 }
 0x265   : > { %3976 = vmatprep.subr.bf16.mxu1 %v4398_v4 }
 0x26b   : > { %3973 = vmatmul.mubr.msk.bf16.vlgmr.msra.gmra.mxu1 %vm1792_vm1, %v935_v6 }
 0x26c   : > { %3978 = vmatprep.mubr.msk.bf16.mxu1 %vm4399_vm0, %v4398_v4 }
 0x274   : > { %v1248_v30 = vpop.f32.mrf.mxu0  ;;  %v1354_v31 = vpop.f32.mrf.mxu1 }
 0x276   : > { %v3862_v32 = vpop.f32.mrf.mxu0  ;;  %v3882_v33 = vpop.f32.mrf.mxu1 }
 0x278   : > { %v1251_v34 = vpop.f32.mrf.mxu0  ;;  %v1357_v35 = vpop.f32.mrf.mxu1 }
 0x279   : > { %v1363_v36 = vpack.c.bf16 %v1251_v34, %v1248_v30  ;;  %v1364_v40 = vpack.c.bf16 %v1357_v35, %v1354_v31 }
 0x27a   : > { %v3863_v37 = vpop.f32.mrf.mxu0  ;;  %v3883_v38 = vpop.f32.mrf.mxu1 }
 0x27b   : > { %v1891_v39 = vsel %vm1792_vm1, %v1363_v36, 0  ;;  %v1938_v41 = vsel %vm1792_vm1, %v1364_v40, 0 }
 0x27c   : > { %3977 = vmatpush3.bf16.xpose.msra.mxu1 %v1891_v39 }
 0x27d   : > { %3982 = vmatprep.subr.bf16.mxu1 %v4398_v4 }
 0x283   : > { %3979 = vmatmul.mubr.msk.bf16.vlgmr.msra.gmra.mxu1 %vm1792_vm1, %v936_v14 }
 0x284   : > { %3983 = vmatpush3.bf16.xpose.msra.mxu1 %v1938_v41  ;;  %3984 = vmatprep.mubr.msk.bf16.mxu1 %vm4399_vm0, %v4398_v4 }
 0x285   : > { %3994 = vmatprep.subr.bf16.mxu1 %v4398_v4 }
 0x28b   : > { %3985 = vmatmul.mubr.msk.bf16.vlgmr.msra.gmra.mxu1 %vm1792_vm1, %v937_v15 }
 0x28c   : > { %3996 = vmatprep.mubr.msk.bf16.mxu1 %vm4399_vm0, %v4398_v4 }
 0x294   : > { %v1463_v42 = vpop.f32.mrf.mxu0  ;;  %v1569_v43 = vpop.f32.mrf.mxu1 }
 0x296   : > { %v3902_v44 = vpop.f32.mrf.mxu0  ;;  %v3922_v46 = vpop.f32.mrf.mxu1 }
 0x298   : > { %v1466_v47 = vpop.f32.mrf.mxu0  ;;  %v1572_v48 = vpop.f32.mrf.mxu1 }
 0x299   : > { %v1788_v49 = vpack.c.bf16 %v1466_v47, %v1463_v42  ;;  %v1789_v50 = vpack.c.bf16 %v1572_v48, %v1569_v43 }
 0x29a   : > { %v3903_v51 = vpop.f32.mrf.mxu0  ;;  %v3923_v52 = vpop.f32.mrf.mxu1 }
 0x29b   : > { %3989 = vmatpush3.bf16.msra.mxu0 %v1788_v49  ;;  %3995 = vmatpush3.bf16.msra.mxu1 %v1789_v50 }
 0x29c   : > { %4000 = vmatprep.subr.bf16.mxu0 %v4398_v4  ;;  %4006 = vmatprep.subr.bf16.mxu1 %v4398_v4 }
 0x2b4   : > { %v4995_v53 = vpop.f32.mrf.mxu0  ;;  %v4997_v54 = vpop.f32.mrf.mxu1 }
 0x2b6   : > { %v3942_v55 = vpop.f32.mrf.mxu0  ;;  %v3962_v56 = vpop.f32.mrf.mxu1 }
 0x2b8   : > { %v4999_v57 = vpop.f32.mrf.mxu0  ;;  %v5001_v58 = vpop.f32.mrf.mxu1 }
 0x2b9   : > { %v1790_v59 = vpack.c.bf16 %v4999_v57, %v4995_v53  ;;  %v1791_v60 = vpack.c.bf16 %v5001_v58, %v4997_v54 }
 0x2ba   : > { %v3943_v61 = vpop.f32.mrf.mxu0  ;;  %v3963_v62 = vpop.f32.mrf.mxu1 }
 0x323   : > { %v1833_v63 = vpop.f32.mrf.mxu1 }
 0x324   : > { %v1982_v0 = vsel %vm1981_vm2, %v1833_v63, -inf }
 0x325   : > { %1983 = vmax.xlane.f32.xlu0 %v1982_v0  ;;  %v3968_v1 = vpop.f32.mrf.mxu1 }
 0x327   : > { %v1836_v2 = vpop.f32.mrf.mxu1 }
 0x328   : > { %v1985_v3 = vsel %vm1981_vm2, %v1836_v2, -inf }
 0x329   : > { %1986 = vmax.xlane.f32.xlu1 %v1985_v3  ;;  %v3969_v5 = vpop.f32.mrf.mxu1 }
 0x32b   : > { %v1880_v6 = vpop.f32.mrf.mxu1 }
 0x32c   : > { %v1988_v7 = vsel %vm1981_vm2, %v1880_v6, -inf }
 0x32d   : > { %1989 = vmax.xlane.f32.xlu0 %v1988_v7  ;;  %v3974_v8 = vpop.f32.mrf.mxu1 }
 0x32f   : > { %v1883_v9 = vpop.f32.mrf.mxu1 }
 0x330   : > { %v1991_v10 = vsel %vm1981_vm2, %v1883_v9, -inf }
 0x331   : > { %1992 = vmax.xlane.f32.xlu1 %v1991_v10  ;;  %v3975_v11 = vpop.f32.mrf.mxu1 }
 0x343   : > { %v1927_v45 = vpop.f32.mrf.mxu1 }
 0x344   : > { %v1994_v12 = vsel %vm1981_vm2, %v1927_v45, -inf }
 0x345   : > { %1995 = vmax.xlane.f32.xlu0 %v1994_v12  ;;  %v3980_v13 = vpop.f32.mrf.mxu1 }
 0x347   : > { %v1930_v14 = vpop.f32.mrf.mxu1 }
 0x348   : > { %v1997_v15 = vsel %vm1981_vm2, %v1930_v14, -inf }
 0x349   : > { %1998 = vmax.xlane.f32.xlu1 %v1997_v15  ;;  %v3981_v16 = vpop.f32.mrf.mxu1 }
 0x34b   : > { %v1974_v17 = vpop.f32.mrf.mxu1 }
 0x34c   : > { %v2000_v18 = vsel %vm1981_vm2, %v1974_v17, -inf }
 0x34d   : > { %2001 = vmax.xlane.f32.xlu0 %v2000_v18  ;;  %v3986_v19 = vpop.f32.mrf.mxu1 }
 0x34f   : > { %v1977_v20 = vpop.f32.mrf.mxu1 }
 0x350   : > { %v2003_v21 = vsel %vm1981_vm2, %v1977_v20, -inf }
 0x351   : > { %2004 = vmax.xlane.f32.xlu1 %v2003_v21  ;;  %v3987_v22 = vpop.f32.mrf.mxu1 }
 0x3ae   : > { %v1984_v23 = vpop.xlane.xlu0 %1983 }
 0x3af   : > { %v2006_v24 = vsub.f32 %v1833_v63, %v1984_v23 }
 0x3b1   : > { %v2014_v25 = vmul.f32 1.442695, %v2006_v24 }
 0x3b2   : > { %v1987_v26 = vpop.xlane.xlu1 %1986 }
 0x3b3   : > { %4282 = vpow2.f32 %v2014_v25  ;;  %v2007_v27 = vsub.f32 %v1836_v2, %v1987_v26 }
 0x3b5   : > { %v2016_v28 = vmul.f32 1.442695, %v2007_v27 }
 0x3b6   : > { %v1990_v29 = vpop.xlane.xlu0 %1989 }
 0x3b7   : > { %4284 = vpow2.f32 %v2016_v28  ;;  %v2008_v30 = vsub.f32 %v1880_v6, %v1990_v29 }
 0x3b9   : > { %v2018_v31 = vmul.f32 1.442695, %v2008_v30 }
 0x3ba   : > { %v1993_v32 = vpop.xlane.xlu1 %1992 }
 0x3bb   : > { %4286 = vpow2.f32 %v2018_v31  ;;  %v2009_v33 = vsub.f32 %v1883_v9, %v1993_v32  ;;  %v4190_v31 = vld [vmem:[%s5357_s6 + $0x38] sm:$0xff]  }
 0x3bd   : > { %v2020_v34 = vmul.f32 1.442695, %v2009_v33  ;;  %v4191_v33 = vld [vmem:[%s5357_s6 + $0x30] sm:$0xff]  }
 0x3bf   : > { %4288 = vpow2.f32 %v2020_v34 }
 0x3c0   : > { %v4283_v35 = vpop.eup %4282 }
 0x3c1   : > { %v2030_v36 = vsel %vm1981_vm2, %v4283_v35, 0.0 }
 0x3c2   : > { %2031 = vadd.xlane.f32.xlu0 %v2030_v36  ;;  %v4192_v36 = vld [vmem:[%s5357_s6 + $0x28] sm:$0xff]  }
 0x3c4   : > { %v4285_v37 = vpop.eup %4284 }
 0x3c5   : > { %v2033_v38 = vsel %vm1981_vm2, %v4285_v37, 0.0 }
 0x3c6   : > { %2034 = vadd.xlane.f32.xlu1 %v2033_v38 }
 0x3c8   : > { %v4287_v39 = vpop.eup %4286 }
 0x3c9   : > { %v2036_v40 = vsel %vm1981_vm2, %v4287_v39, 0.0 }
 0x3ca   : > { %2037 = vadd.xlane.f32.xlu0 %v2036_v40  ;;  %v4193_v40 = vld [vmem:[%s5357_s6 + $0x20] sm:$0xff]  }
 0x3cc   : > { %v4289_v41 = vpop.eup %4288 }
 0x3cd   : > { %v2039_v42 = vsel %vm1981_vm2, %v4289_v41, 0.0 }
 0x3ce   : > { %v1996_v43 = vpop.xlane.xlu0 %1995  ;;  %2040 = vadd.xlane.f32.xlu1 %v2039_v42  ;;  %v4195_v42 = vld [vmem:[%s5357_s6 + $0x10] sm:$0xff]  }
 0x3cf   : > { %v2010_v44 = vsub.f32 %v1927_v45, %v1996_v43  ;;  %v4196_v43 = vld [vmem:[%s5357_s6 + $0x8] sm:$0xff]  }
 0x3d1   : > { %v2022_v46 = vmul.f32 1.442695, %v2010_v44 }
 0x3d2   : > { %v1999_v47 = vpop.xlane.xlu1 %1998 }
 0x3d3   : > { %4290 = vpow2.f32 %v2022_v46  ;;  %v2011_v48 = vsub.f32 %v1930_v14, %v1999_v47  ;;  %v4197_v47 = vld [vmem:[%s5357_s6] sm:$0xff]  }
 0x3d5   : > { %v2024_v49 = vmul.f32 1.442695, %v2011_v48 }
 0x3d6   : > { %v2002_v50 = vpop.xlane.xlu0 %2001 }
 0x3d7   : > { %4292 = vpow2.f32 %v2024_v49  ;;  %v2012_v51 = vsub.f32 %v1974_v17, %v2002_v50 }
 0x3d9   : > { %v2026_v52 = vmul.f32 1.442695, %v2012_v51 }
 0x3da   : > { %v2005_v55 = vpop.xlane.xlu1 %2004 }
 0x3db   : > { %4294 = vpow2.f32 %v2026_v52  ;;  %v2013_v56 = vsub.f32 %v1977_v20, %v2005_v55 }
 0x3dd   : > { %v2028_v61 = vmul.f32 1.442695, %v2013_v56 }
 0x3df   : > { %4296 = vpow2.f32 %v2028_v61 }
 0x3e0   : > { %v4291_v62 = vpop.eup %4290 }
 0x3e1   : > { %v2042_v63 = vsel %vm1981_vm2, %v4291_v62, 0.0 }
 0x3e2   : > { %2043 = vadd.xlane.f32.xlu0 %v2042_v63 }
 0x3e4   : > { %v4293_v0 = vpop.eup %4292 }
 0x3e5   : > { %v2045_v1 = vsel %vm1981_vm2, %v4293_v0, 0.0 }
 0x3e6   : > { %2046 = vadd.xlane.f32.xlu1 %v2045_v1 }
 0x3e8   : > { %v4295_v2 = vpop.eup %4294 }
 0x3e9   : > { %v2048_v3 = vsel %vm1981_vm2, %v4295_v2, 0.0 }
 0x3ea   : > { %2049 = vadd.xlane.f32.xlu0 %v2048_v3 }
 0x3ec   : > { %v4297_v5 = vpop.eup %4296 }
 0x3ed   : > { %v2051_v6 = vsel %vm1981_vm2, %v4297_v5, 0.0 }
 0x3ee   : > { %2052 = vadd.xlane.f32.xlu1 %v2051_v6 }
 0x44b   : > { %v2032_v7 = vpop.xlane.xlu0 %2031 }
 0x44c   : > { %4298 = vrcp.f32 %v2032_v7 }
 0x44f   : > { %v2035_v8 = vpop.xlane.xlu1 %2034 }
 0x450   : > { %4300 = vrcp.f32 %v2035_v8 }
 0x453   : > { %v2038_v9 = vpop.xlane.xlu0 %2037 }
 0x454   : > { %4302 = vrcp.f32 %v2038_v9 }
 0x457   : > { %v2041_v10 = vpop.xlane.xlu1 %2040 }
 0x458   : > { %4304 = vrcp.f32 %v2041_v10 }
 0x459   : > { %v4299_v11 = vpop.eup %4298 }
 0x45a   : > { %v2062_v12 = vmul.f32 %v4299_v11, %v4283_v35 }
 0x45d   : > { %v4301_v45 = vpop.eup %4300 }
 0x45e   : > { %v2063_v13 = vmul.f32 %v4301_v45, %v4285_v37 }
 0x460   : > { %v2070_v14 = vpack.c.bf16 %v2063_v13, %v2062_v12  ;;  %v3464_v13 = vld [vmem:[%s5358_s7] ss:$0 sm:$0xff] }
 0x461   : > { %v4303_v15 = vpop.eup %4302 }
 0x462   : > { %3991 = vmatmul.mubr.msk.bf16.vlgmr.msra.gmra.mxu0 %vm1981_vm2, %v2070_v14  ;;  %v2064_v17 = vmul.f32 %v4303_v15, %v4287_v39 }
 0x463   : > { %4001 = vmatpush3.bf16.msra.mxu0 %v1790_v59  ;;  %4002 = vmatprep.mubr.msk.bf16.mxu0 %vm4399_vm0, %v4398_v4 }
 0x464   : > { %4012 = vmatprep.subr.bf16.mxu0 %v4398_v4 }
 0x465   : > { %v4305_v16 = vpop.eup %4304 }
 0x466   : > { %v2065_v18 = vmul.f32 %v4305_v16, %v4289_v41  ;;  %v4194_v41 = vld [vmem:[%s5357_s6 + $0x18] sm:$0xff]  }
 0x468   : > { %v2071_v19 = vpack.c.bf16 %v2065_v18, %v2064_v17  ;;  %v4334_v17 = vld [vmem:[%s4535_s18] sm:$0xff] }
 0x46a   : > { %3997 = vmatmul.mubr.msk.bf16.vlgmr.msra.gmra.mxu1 %vm1981_vm2, %v2071_v19 }
 0x46b   : > { %4007 = vmatpush3.bf16.msra.mxu1 %v1791_v60  ;;  %v2044_v20 = vpop.xlane.xlu0 %2043  ;;  %4008 = vmatprep.mubr.msk.bf16.mxu1 %vm4399_vm0, %v4398_v4 }
 0x46c   : > { %4306 = vrcp.f32 %v2044_v20 }
 0x46f   : > { %v2047_v53 = vpop.xlane.xlu1 %2046 }
 0x470   : > { %4308 = vrcp.f32 %v2047_v53 }
 0x473   : > { %v2050_v57 = vpop.xlane.xlu0 %2049 }
 0x474   : > { %4310 = vrcp.f32 %v2050_v57  ;;  %v4335_v57 = vld [vmem:[%s4535_s18 + $0x8] sm:$0xff]  ;;  %s460_s18 = scalar_lea.vmem [#allocation2], %s3211_s27  ;;  %s4342_s27 = scalar_lea.vmem %s4341_s26, 512 }
 0x475   : > { %s3145_s28 = sshll.u32 %s460_s18, 4  ;;  %s5303_s28 = int_to_ptr.vmem [resolvable:$true] %s3145_s28 }
 0x476   : > { %p4343_p0 = scmp.lt.s32.totalorder %s5303_s28, %s4341_s26 }
 0x477   : > { %v2053_v59 = vpop.xlane.xlu1 %2052 }
 0x478   : > { %4312 = vrcp.f32 %v2053_v59 }
 0x479   : > { %v4307_v21 = vpop.eup %4306 }
 0x47a   : > { %v2066_v23 = vmul.f32 %v4307_v21, %v4291_v62  ;;  %v4198_v21 = vld [vmem:[%s5361_s10 + $0xe0] ss:$16 sps:$4 sm:$0xff]  }
 0x47d   : > { %v4309_v22 = vpop.eup %4308 }
 0x47e   : > { %v2067_v24 = vmul.f32 %v4309_v22, %v4293_v0  ;;  %v4200_v22 = vld [vmem:[%s5361_s10 + $0xe4] ss:$16 sps:$4 sm:$0xff]  }
 0x47f   : > { %2652 = vmatprep.subr.bf16.mxu1 %v4200_v22  ;;  %v4251_v22 = vld [vmem:[%s5363_s12 + $0xf0] sm:$0xff]  }
 0x480   : > { %v2072_v25 = vpack.c.bf16 %v2067_v24, %v2066_v23  ;;  %v4201_v23 = vld [vmem:[%s5361_s10 + $0xe8] ss:$16 sps:$4 sm:$0xff]   ;;  %v4203_v24 = vld [vmem:[%s5361_s10 + $0xec] ss:$16 sps:$4 sm:$0xff]  }
 0x481   : > { %v4311_v54 = vpop.eup %4310 }
 0x482   : > { %4003 = vmatmul.mubr.msk.bf16.vlgmr.msra.gmra.mxu0 %vm1981_vm2, %v2072_v25  ;;  %v2068_v60 = vmul.f32 %v4311_v54, %v4295_v2 }
 0x483   : > { %4028 = vmatprep.mubr.msk.bf16.mxu0 %vm4399_vm0, %v4398_v4  ;;  %4013 = vmatpush3.bf16.msra.mxu0 %v4190_v31  ;;  %v4209_v31 = vld [vmem:[%s5361_s10 + $0xcc] ss:$16 sps:$4 sm:$0xff]  }
 0x484   : > { %4014 = vmatprep.subr.bf16.mxu0 %v4398_v4 }
 0x485   : > { %v4313_v58 = vpop.eup %4312 }
 0x486   : > { %v2069_v26 = vmul.f32 %v4313_v58, %v4297_v5 }
 0x487   : > { %4015 = vmatpush3.bf16.msra.mxu0 %v4191_v33  ;;  %v4207_v33 = vld [vmem:[%s5361_s10 + $0xc8] ss:$16 sps:$4 sm:$0xff]  }
 0x488   : > { %v2073_v27 = vpack.c.bf16 %v2069_v26, %v2068_v60  ;;  %4016 = vmatprep.subr.bf16.mxu0 %v4398_v4 }
 0x48a   : > { %4009 = vmatmul.mubr.msk.bf16.vlgmr.msra.gmra.mxu1 %vm1981_vm2, %v2073_v27 }
 0x48b   : > { %4017 = vmatpush3.bf16.msra.mxu0 %v4192_v36  ;;  %2653 = vmatpush1.bf16.msra.mxu1 %v4198_v21  ;;  %v4210_v36 = vld [vmem:[%s5361_s10 + $0xa0] ss:$16 sps:$4 sm:$0xff]  }
 0x48c   : > { %4018 = vmatprep.subr.bf16.mxu0 %v4398_v4  ;;  %v4250_v21 = vld [vmem:[%s5363_s12 + $0x70] sm:$0xff]  }
 0x48f   : > { %4019 = vmatpush3.bf16.msra.mxu0 %v4193_v40  ;;  %v4219_v40 = vld [vmem:[%s5361_s10 + $0x88] ss:$16 sps:$4 sm:$0xff]  }
 0x490   : > { %4020 = vmatprep.subr.bf16.mxu0 %v4398_v4 }
 0x493   : > { %4021 = vmatpush3.bf16.msra.mxu0 %v4194_v41  ;;  %v4221_v41 = vld [vmem:[%s5361_s10 + $0x8c] ss:$16 sps:$4 sm:$0xff]  }
 0x494   : > { %4022 = vmatprep.subr.bf16.mxu0 %v4398_v4 }
 0x497   : > { %4023 = vmatpush3.bf16.msra.mxu0 %v4195_v42  ;;  %v4224_v42 = vld [vmem:[%s5361_s10 + $0x64] ss:$16 sps:$4 sm:$0xff]  }
 0x498   : > { %4024 = vmatprep.subr.bf16.mxu0 %v4398_v4 }
 0x49b   : > { %4025 = vmatpush3.bf16.msra.mxu0 %v4196_v43  ;;  %v4227_v43 = vld [vmem:[%s5361_s10 + $0x6c] ss:$16 sps:$4 sm:$0xff]  }
 0x49c   : > { %4026 = vmatprep.subr.bf16.mxu0 %v4398_v4 }
 0x49f   : > { %4027 = vmatpush3.bf16.msra.mxu0 %v4197_v47  ;;  %v4230_v47 = vld [vmem:[%s5361_s10 + $0x44] ss:$16 sps:$4 sm:$0xff]  }
 0x4a0   : > { %2695 = vmatprep.subr.bf16.mxu0 %v4203_v24  ;;  %v4253_v24 = vld [vmem:[%s5363_s12 + $0xb0] sm:$0xff]  }
 0x522   : > { %v2111_v28 = vpop.f32.mrf.mxu0 }
 0x524   : > { %v3992_v29 = vpop.f32.mrf.mxu0 }
 0x526   : > { %v2114_v30 = vpop.f32.mrf.mxu0 }
 0x528   : > { %v3993_v32 = vpop.f32.mrf.mxu0 }
 0x529   : > { %v4204_v32 = vld [vmem:[%s5361_s10 + $0xc0] ss:$16 sps:$4 sm:$0xff]  }
 0x52a   : > { %v2155_v34 = vpop.f32.mrf.mxu1 }
 0x52c   : > { %v3998_v35 = vpop.f32.mrf.mxu1 }
 0x52d   : > { %v4215_v35 = vld [vmem:[%s5361_s10 + $0xac] ss:$16 sps:$4 sm:$0xff]  }
 0x52e   : > { %v2158_v37 = vpop.f32.mrf.mxu1 }
 0x52f   : > { %v4079_v38 = vpack.i.bf16 %v2158_v37, %v2155_v34  ;;  %v4212_v34 = vld [vmem:[%s5361_s10 + $0xa4] ss:$16 sps:$4 sm:$0xff]   ;;  %v4213_v37 = vld [vmem:[%s5361_s10 + $0xa8] ss:$16 sps:$4 sm:$0xff]  }
 0x530   : > { %v3999_v39 = vpop.f32.mrf.mxu1 }
 0x531   : > { %4080 = vrot.lane.b32.xlu0 %v4079_v38, %s4400_s15  ;;  %v4216_v38 = vld [vmem:[%s5361_s10 + $0x80] ss:$16 sps:$4 sm:$0xff]   ;;  %v4218_v39 = vld [vmem:[%s5361_s10 + $0x84] ss:$16 sps:$4 sm:$0xff]   ;;  %s5309_s15 = scalar_lea.hbm %s5365_s14, %s3546_s20 }
 0x542   : > { %v2199_v44 = vpop.f32.mrf.mxu0 }
 0x544   : > { %v4004_v46 = vpop.f32.mrf.mxu0 }
 0x545   : > { %v4225_v46 = vld [vmem:[%s5361_s10 + $0x68] ss:$16 sps:$4 sm:$0xff]  }
 0x546   : > { %v2202_v48 = vpop.f32.mrf.mxu0 }
 0x547   : > { %v4084_v49 = vpack.i.bf16 %v2202_v48, %v2199_v44  ;;  %v4222_v44 = vld [vmem:[%s5361_s10 + $0x60] ss:$16 sps:$4 sm:$0xff]   ;;  %v4233_v48 = vld [vmem:[%s5361_s10 + $0x4c] ss:$16 sps:$4 sm:$0xff]  }
 0x548   : > { %v4005_v50 = vpop.f32.mrf.mxu0 }
 0x549   : > { %4085 = vrot.lane.b32.xlu1 %v4084_v49, %s4401_s22  ;;  %v4403_v49 = vmov 0   ;;  %v4228_v50 = vld [vmem:[%s5361_s10 + $0x40] ss:$16 sps:$4 sm:$0xff]   ;;  %s5311_s22 = scalar_lea.sflag [#allocation3], %s458_s0 }
 0x54a   : > { %v2243_v51 = vpop.f32.mrf.mxu1  ;;  %2684 = vmatprep.mubr.bf16.mxu1 %v4403_v49 }
 0x54c   : > { %v4010_v52 = vpop.f32.mrf.mxu1 }
 0x54d   : > { %v4236_v52 = vld [vmem:[%s5361_s10 + $0x24] ss:$16 sps:$4 sm:$0xff]  }
 0x54e   : > { %v2246_v55 = vpop.f32.mrf.mxu1 }
 0x54f   : > { %v4089_v56 = vpack.i.bf16 %v2246_v55, %v2243_v51  ;;  %v4231_v51 = vld [vmem:[%s5361_s10 + $0x48] ss:$16 sps:$4 sm:$0xff]   ;;  %v4239_v55 = vld [vmem:[%s5361_s10 + $0x2c] ss:$16 sps:$4 sm:$0xff]  }
 0x550   : > { %v4011_v61 = vpop.f32.mrf.mxu1 }
 0x551   : > { %4090 = vrot.lane.b32.xlu1 %v4089_v56, %s4402_s25  ;;  %v4234_v56 = vld [vmem:[%s5361_s10 + $0x20] ss:$16 sps:$4 sm:$0xff]   ;;  %v4237_v61 = vld [vmem:[%s5361_s10 + $0x28] ss:$16 sps:$4 sm:$0xff]   ;;  %s4336_s25 = scalar_lea.vmem %s5303_s28, 256 }
 0x552   : > { %p4337_p11 = scmp.ne.s32.totalorder %s5303_s28, %s4336_s25  ;;  %p4344_p1 = scmp.lt.s32.totalorder %s4342_s27, %s4336_s25 }
 0x554   : > { %p4338_p12 = pnand %p4337_p11, %p4520_p5  ;;  %p4345_p2 = por %p4344_p1, %p4343_p0 }
 0x556   : > { %p4339_p13 = pneg %p4338_p12 }
 0x558   : > { %p4346_p3 = pnand %p4345_p2, %p4339_p13 }
 0x5a3   : > { %v4081_v62 = vpop.permute.xlu0 %4080 }
 0x5a4   : > { %v4083_v4 = vunpack.i.h.bf16 %v4081_v62  ;;  %v4082_v0 = vunpack.i.l.bf16 %v4081_v62  ;;  %v4242_v62 = vld [vmem:[%s5361_s10 + $0x4] ss:$16 sps:$4 sm:$0xff]  }
 0x5a6   : > { %v2274_v5 = vsel %vm1792_vm1, %v2111_v28, %v4082_v0  ;;  %v2275_v6 = vsel %vm1792_vm1, %v2114_v30, %v4083_v4  ;;  %v4206_v30 = vld [vmem:[%s5361_s10 + $0xc4] ss:$16 sps:$4 sm:$0xff]   ;;  %v4240_v4 = vld [vmem:[%s5361_s10] ss:$16 sps:$4 sm:$0xff]   ;;  %v4243_v0 = vld [vmem:[%s5361_s10 + $0x8] ss:$16 sps:$4 sm:$0xff]  }
 0x5a7   : > { %2654 = vmatprep.subr.bf16.mxu1 %v4206_v30  ;;  %v4262_v30 = vld [vmem:[%s5363_s12 + $0x58] sm:$0xff]  }
 0x5a8   : > { %2655 = vmatpush1.bf16.msra.mxu1 %v4204_v32  ;;  %v4264_v32 = vld [vmem:[%s5363_s12 + $0x18] sm:$0xff]  }
 0x5a9   : > { %2656 = vmatprep.subr.bf16.mxu1 %v4212_v34  ;;  %v4266_v34 = vld [vmem:[%s5363_s12 + $0x50] sm:$0xff]  }
 0x5ac   : > { %2657 = vmatpush1.bf16.msra.mxu1 %v4210_v36  ;;  %v4268_v36 = vld [vmem:[%s5363_s12 + $0x10] sm:$0xff]  }
 0x5ad   : > { %2658 = vmatprep.subr.bf16.mxu1 %v4218_v39  ;;  %v4271_v39 = vld [vmem:[%s5363_s12 + $0xc8] sm:$0xff]  }
 0x5b0   : > { %2659 = vmatpush1.bf16.msra.mxu1 %v4216_v38  ;;  %v4270_v38 = vld [vmem:[%s5363_s12 + $0x48] sm:$0xff]  }
 0x5b1   : > { %2660 = vmatprep.subr.bf16.mxu1 %v4224_v42  ;;  %v4274_v42 = vld [vmem:[%s5363_s12 + $0x40] sm:$0xff]  }
 0x5b4   : > { %2661 = vmatpush1.bf16.msra.mxu1 %v4222_v44  ;;  %v4276_v44 = vld [vmem:[%s5363_s12] sm:$0xff]  }
 0x5b5   : > { %2662 = vmatprep.subr.bf16.mxu1 %v4230_v47  ;;  %v2472_v47 = vlaneseq }
 0x5b8   : > { %2663 = vmatpush1.bf16.msra.mxu1 %v4228_v50 }
 0x5b9   : > { %2664 = vmatprep.subr.bf16.mxu1 %v4236_v52 }
 0x5bb   : > { %v4086_v63 = vpop.permute.xlu1 %4085 }
 0x5bc   : > { %v4088_v1 = vunpack.i.h.bf16 %v4086_v63  ;;  %v4087_v2 = vunpack.i.l.bf16 %v4086_v63  ;;  %v4245_v63 = vld [vmem:[%s5361_s10 + $0xc] ss:$16 sps:$4 sm:$0xff]   ;;  %2665 = vmatpush1.bf16.msra.mxu1 %v4234_v56 }
 0x5bd   : > { %2666 = vmatprep.subr.bf16.mxu1 %v4242_v62 }
 0x5be   : > { %v2278_v9 = vsel %vm2276_vm3, %v2275_v6, %v4088_v1  ;;  %v2277_v10 = vsel %vm2276_vm3, %v2274_v5, %v4087_v2 }
 0x5c0   : > { %2667 = vmatpush1.bf16.msra.mxu1 %v4240_v4 }
 0x5c3   : > { %v4091_v3 = vpop.permute.xlu1 %4090 }
 0x5c4   : > { %v4093_v7 = vunpack.i.h.bf16 %v4091_v3  ;;  %v4092_v8 = vunpack.i.l.bf16 %v4091_v3 }
 0x5c6   : > { %v2280_v11 = vsel %vm2279_vm4, %v2277_v10, %v4092_v8  ;;  %v2281_v45 = vsel %vm2279_vm4, %v2278_v9, %v4093_v7  ;;  %v3473_v10 = vld [vmem:[%s5359_s8] ss:$0 sm:$0xff] }
 0x5c7   : > { %v2282_v12 = vpack.c.bf16 %v2281_v45, %v2280_v11 }
 0x5c9   : > { %4029 = vmatmul.mubr.bf16.vlgmr.msra.gmra.mxu0 %v2282_v12 }
 0x5ca   : > { %2696 = vmatpush1.bf16.msra.mxu0 %v4201_v23  ;;  %2727 = vmatprep.mubr.bf16.mxu0 %v4403_v49  ;;  %v4252_v23 = vld [vmem:[%s5363_s12 + $0x30] sm:$0xff]  }
 0x5cb   : > { %2697 = vmatprep.subr.bf16.mxu0 %v4209_v31  ;;  %v4263_v31 = vld [vmem:[%s5363_s12 + $0xd8] sm:$0xff]  }
 0x5ce   : > { %2698 = vmatpush1.bf16.msra.mxu0 %v4207_v33  ;;  %v4265_v33 = vld [vmem:[%s5363_s12 + $0x98] sm:$0xff]  }
 0x5cf   : > { %2699 = vmatprep.subr.bf16.mxu0 %v4215_v35  ;;  %v4267_v35 = vld [vmem:[%s5363_s12 + $0xd0] sm:$0xff]  }
 0x5d2   : > { %2700 = vmatpush1.bf16.msra.mxu0 %v4213_v37  ;;  %v4269_v37 = vld [vmem:[%s5363_s12 + $0x90] sm:$0xff]  }
 0x5d3   : > { %2701 = vmatprep.subr.bf16.mxu0 %v4221_v41  ;;  %v4273_v41 = vld [vmem:[%s5363_s12 + $0x88] sm:$0xff]  }
 0x5d6   : > { %2702 = vmatpush1.bf16.msra.mxu0 %v4219_v40  ;;  %v4272_v40 = vld [vmem:[%s5363_s12 + $0x8] sm:$0xff]  }
 0x5d7   : > { %2703 = vmatprep.subr.bf16.mxu0 %v4227_v43  ;;  %v4275_v43 = vld [vmem:[%s5363_s12 + $0xc0] sm:$0xff]  }
 0x5da   : > { %2704 = vmatpush1.bf16.msra.mxu0 %v4225_v46  ;;  %v4277_v46 = vld [vmem:[%s5363_s12 + $0x80] sm:$0xff]  }
 0x5db   : > { %2705 = vmatprep.subr.bf16.mxu0 %v4233_v48  ;;  %v2473_v48 = vshrl.u32 %v2472_v47, 7 }
 0x5dd   : > { %v2474_v49 = vsub.s32 0, %v2473_v48  ;;  %v2482_v50 = vsub.s32 2, %v2473_v48  ;;  %v2478_v52 = vsub.s32 1, %v2473_v48 }
 0x5de   : > { %2706 = vmatpush1.bf16.msra.mxu0 %v4231_v51  ;;  %v2470_v51 = vld [vmem:[%s5362_s11] sm:$0xf] }
 0x5df   : > { %2707 = vmatprep.subr.bf16.mxu0 %v4239_v55  ;;  %v2486_v55 = vsub.s32 3, %v2473_v48  ;;  %v2475_v56 = vrot.slane %v2470_v51, %v2474_v49  ;;  %v2479_v4 = vrot.slane %v2470_v51, %v2478_v52 }
 0x5e2   : > { %2708 = vmatpush1.bf16.msra.mxu0 %v4237_v61  ;;  %v2483_v61 = vrot.slane %v2470_v51, %v2482_v50 }
 0x5e3   : > { %2709 = vmatprep.subr.bf16.mxu0 %v4245_v63 }
 0x5e6   : > { %2710 = vmatpush1.bf16.msra.mxu0 %v4243_v0  ;;  %v2487_v0 = vrot.slane %v2470_v51, %v2486_v55 }
 0x689   : > { %v2388_v14 = vpop.f32.mrf.mxu0 }
 0x68a   : > { %v2389_v15 = vadd.f32 %v3464_v13, %v2388_v14 }
 0x68b   : > { %v4030_v16 = vpop.f32.mrf.mxu0 }
 0x68c   : > { %v5077_v18 = vadd.f32 %v4334_v17, %v2389_v15 }
 0x68d   : > { %v2391_v19 = vpop.f32.mrf.mxu0 }
 0x68e   : > { %v2392_v20 = vadd.f32 %v3464_v13, %v2391_v19  ;;  %2399 = vadd.xlane.f32.xlu1 %v5077_v18  ;;  %v3474_v13 = vld [vmem:[%s5360_s9] ss:$0 sm:$0xff]  ;;  %v4246_v19 = vld [vmem:[%s5363_s12 + $0x78] sm:$0xff]  }
 0x68f   : > { %v4031_v53 = vpop.f32.mrf.mxu0  ;;  %3680 = vmatprep.subr.bf16.mxu1 %v4246_v19 }
 0x690   : > { %v5081_v59 = vadd.f32 %v4335_v57, %v2392_v20  ;;  %v4247_v20 = vld [vmem:[%s5363_s12 + $0xf8] sm:$0xff]  }
 0x691   : > { %v4248_v53 = vld [vmem:[%s5363_s12 + $0x38] sm:$0xff]   ;;  %3702 = vmatprep.subr.bf16.mxu0 %v4247_v20 }
 0x692   : > { %2401 = vadd.xlane.f32.xlu0 %v5081_v59  ;;  %v4249_v57 = vld [vmem:[%s5363_s12 + $0xb8] sm:$0xff]  }
 0x717   : > { %v2400_v25 = vpop.xlane.xlu1 %2399 }
 0x718   : > { %v2403_v54 = vmul.f32 0.0078125, %v2400_v25  ;;  %v4254_v25 = vld [vmem:[%s5363_s12 + $0x68] sm:$0xff]  }
 0x71a   : > { %v5097_v58 = vsub.f32 %v5077_v18, %v2403_v54  ;;  %v4255_v54 = vld [vmem:[%s5363_s12 + $0xe8] sm:$0xff]  }
 0x71b   : > { %v2402_v60 = vpop.xlane.xlu0 %2401 }
 0x71c   : > { %v2404_v26 = vmul.f32 0.0078125, %v2402_v60  ;;  %v2407_v27 = vmul.f32 %v5097_v58, %v5097_v58  ;;  %v4257_v60 = vld [vmem:[%s5363_s12 + $0xa8] sm:$0xff]  }
 0x71e   : > { %v5102_v28 = vsub.f32 %v5081_v59, %v2404_v26  ;;  %2409 = vadd.xlane.f32.xlu0 %v2407_v27  ;;  %v4258_v26 = vld [vmem:[%s5363_s12 + $0x60] sm:$0xff]  }
 0x71f   : > { %v4259_v27 = vld [vmem:[%s5363_s12 + $0xe0] sm:$0xff]  }
 0x720   : > { %v2408_v29 = vmul.f32 %v5102_v28, %v5102_v28 }
 0x722   : > { %2411 = vadd.xlane.f32.xlu0 %v2408_v29  ;;  %v4261_v29 = vld [vmem:[%s5363_s12 + $0xa0] sm:$0xff]  }
 0x7a7   : > { %v2410_v1 = vpop.xlane.xlu0 %2409 }
 0x7a8   : > { %v2413_v2 = vmul.f32 0.0078125, %v2410_v1 }
 0x7aa   : > { %v2415_v3 = vadd.f32 1e-05, %v2413_v2 }
 0x7ab   : > { %v2412_v5 = vpop.xlane.xlu0 %2411 }
 0x7ac   : > { %4314 = vrsqrt.f32 %v2415_v3  ;;  %v2414_v6 = vmul.f32 0.0078125, %v2412_v5 }
 0x7ae   : > { %v2416_v7 = vadd.f32 1e-05, %v2414_v6 }
 0x7b0   : > { %4316 = vrsqrt.f32 %v2416_v7 }
 0x7b9   : > { %v4315_v8 = vpop.eup %4314 }
 0x7ba   : > { %v2419_v9 = vmul.f32 %v4315_v8, %v5097_v58  ;;  %v4256_v58 = vld [vmem:[%s5363_s12 + $0x28] sm:$0xff]  }
 0x7bc   : > { %v2427_v12 = vmul.f32 %v3473_v10, %v2419_v9 }
 0x7bd   : > { %v4317_v11 = vpop.eup %4316 }
 0x7be   : > { %v2420_v45 = vmul.f32 %v4317_v11, %v5102_v28  ;;  %v2435_v15 = vadd.f32 %v3474_v13, %v2427_v12  ;;  %v4260_v28 = vld [vmem:[%s5363_s12 + $0x20] sm:$0xff]  }
 0x7c0   : > { %v2428_v14 = vmul.f32 %v3473_v10, %v2420_v45 }
 0x7c2   : > { %v2436_v16 = vadd.f32 %v3474_v13, %v2428_v14 }
 0x7c4   : > { %v2437_v17 = vpack.c.bf16 %v2436_v16, %v2435_v15 }
 0x7c6   : > { %2685 = vmatmul.mubr.bf16.vlgmr.msra.gmra.mxu1 %v2437_v17  ;;  %2728 = vmatmul.mubr.bf16.vlgmr.msra.gmra.mxu0 %v2437_v17 }
 0x7c7   : > { %3681 = vmatpush3.bf16.msra.mxu1 %v4248_v53  ;;  %3703 = vmatpush3.bf16.msra.mxu0 %v4249_v57 }
 0x7c8   : > { %3682 = vmatprep.subr.bf16.mxu1 %v4250_v21  ;;  %3704 = vmatprep.subr.bf16.mxu0 %v4251_v22 }
 0x7cb   : > { %3683 = vmatpush3.bf16.msra.mxu1 %v4252_v23  ;;  %3705 = vmatpush3.bf16.msra.mxu0 %v4253_v24 }
 0x7cc   : > { %3684 = vmatprep.subr.bf16.mxu1 %v4254_v25  ;;  %3706 = vmatprep.subr.bf16.mxu0 %v4255_v54 }
 0x7cf   : > { %3685 = vmatpush3.bf16.msra.mxu1 %v4256_v58  ;;  %3707 = vmatpush3.bf16.msra.mxu0 %v4257_v60 }
 0x7d0   : > { %3686 = vmatprep.subr.bf16.mxu1 %v4258_v26  ;;  %3708 = vmatprep.subr.bf16.mxu0 %v4259_v27 }
 0x7d3   : > { %3687 = vmatpush3.bf16.msra.mxu1 %v4260_v28  ;;  %3709 = vmatpush3.bf16.msra.mxu0 %v4261_v29 }
 0x7d4   : > { %3688 = vmatprep.subr.bf16.mxu1 %v4262_v30  ;;  %3710 = vmatprep.subr.bf16.mxu0 %v4263_v31 }
 0x7d7   : > { %3689 = vmatpush3.bf16.msra.mxu1 %v4264_v32  ;;  %3711 = vmatpush3.bf16.msra.mxu0 %v4265_v33 }
 0x7d8   : > { %3690 = vmatprep.subr.bf16.mxu1 %v4266_v34  ;;  %3712 = vmatprep.subr.bf16.mxu0 %v4267_v35 }
 0x7db   : > { %3691 = vmatpush3.bf16.msra.mxu1 %v4268_v36  ;;  %3713 = vmatpush3.bf16.msra.mxu0 %v4269_v37 }
 0x7dc   : > { %3692 = vmatprep.subr.bf16.mxu1 %v4270_v38  ;;  %3714 = vmatprep.subr.bf16.mxu0 %v4271_v39 }
 0x7df   : > { %3693 = vmatpush3.bf16.msra.mxu1 %v4272_v40  ;;  %3715 = vmatpush3.bf16.msra.mxu0 %v4273_v41 }
 0x7e0   : > { %3694 = vmatprep.subr.bf16.mxu1 %v4274_v42  ;;  %3716 = vmatprep.subr.bf16.mxu0 %v4275_v43 }
 0x7e3   : > { %3695 = vmatpush3.bf16.msra.mxu1 %v4276_v44  ;;  %3717 = vmatpush3.bf16.msra.mxu0 %v4277_v46 }
 0x886   : > { %v2686_v62 = vpop.f32.mrf.mxu1  ;;  %v2729_v63 = vpop.f32.mrf.mxu0 }
 0x887   : > { %v2687_v1 = vadd.f32 %v2686_v62, %v2475_v56  ;;  %v2730_v2 = vadd.f32 %v2729_v63, %v2483_v61 }
 0x888   : > { %v2688_v3 = vpop.f32.mrf.mxu1  ;;  %v2731_v5 = vpop.f32.mrf.mxu0 }
 0x889   : > { %v2746_v6 = vmul.f32 0.70710677, %v2687_v1  ;;  %v2748_v7 = vmul.f32 0.70710677, %v2730_v2  ;;  %v2689_v8 = vadd.f32 %v2688_v3, %v2479_v4  ;;  %v2732_v9 = vadd.f32 %v2731_v5, %v2487_v0 }
 0x88a   : > { %v2690_v10 = vpop.f32.mrf.mxu1  ;;  %v2733_v11 = vpop.f32.mrf.mxu0  ;;  %v2738_v60 = vmul.f32 0.5, %v2687_v1  ;;  %v2740_v43 = vmul.f32 0.5, %v2730_v2 }
 0x88b   : > { %v2691_v45 = vadd.f32 %v2690_v10, %v2475_v56  ;;  %v2734_v12 = vadd.f32 %v2733_v11, %v2483_v61  ;;  %4318 = verf.f32 %v2746_v6  ;;  %v2747_v13 = vmul.f32 0.70710677, %v2689_v8 }
 0x88c   : > { %v2692_v14 = vpop.f32.mrf.mxu1  ;;  %v2735_v15 = vpop.f32.mrf.mxu0  ;;  %4320 = verf.f32 %v2748_v7  ;;  %v2749_v16 = vmul.f32 0.70710677, %v2732_v9  ;;  %v2739_v26 = vmul.f32 0.5, %v2689_v8  ;;  %v2741_v39 = vmul.f32 0.5, %v2732_v9 }
 0x88d   : > { %v2750_v17 = vmul.f32 0.70710677, %v2691_v45  ;;  %4322 = verf.f32 %v2747_v13  ;;  %v2752_v19 = vmul.f32 0.70710677, %v2734_v12  ;;  %v2693_v20 = vadd.f32 %v2692_v14, %v2479_v4  ;;  %v3507_v4 = vld [vmem:[%s5364_s13] ss:$0 sm:$0xff] }
 0x88e   : > { %v2736_v53 = vadd.f32 %v2735_v15, %v2487_v0  ;;  %4324 = verf.f32 %v2749_v16  ;;  %v2742_v32 = vmul.f32 0.5, %v2691_v45  ;;  %v2744_v36 = vmul.f32 0.5, %v2734_v12 }
 0x88f   : > { %4326 = verf.f32 %v2750_v17  ;;  %v2751_v57 = vmul.f32 0.70710677, %v2693_v20  ;;  %v2743_v37 = vmul.f32 0.5, %v2693_v20 }
 0x890   : > { %4328 = verf.f32 %v2752_v19  ;;  %v2753_v21 = vmul.f32 0.70710677, %v2736_v53  ;;  %v2745_v41 = vmul.f32 0.5, %v2736_v53 }
 0x891   : > { %4330 = verf.f32 %v2751_v57 }
 0x892   : > { %4332 = verf.f32 %v2753_v21 }
 0x898   : > { %v4319_v22 = vpop.eup %4318 }
 0x899   : > { %v4321_v23 = vpop.eup %4320  ;;  %v2762_v30 = vadd.f32 1.0, %v4319_v22 }
 0x89a   : > { %v4323_v24 = vpop.eup %4322  ;;  %v2764_v35 = vadd.f32 1.0, %v4321_v23 }
 0x89b   : > { %v4325_v25 = vpop.eup %4324  ;;  %v2763_v27 = vadd.f32 1.0, %v4323_v24  ;;  %v2770_v48 = vmul.f32 %v2762_v30, %v2738_v60 }
 0x89c   : > { %v4327_v54 = vpop.eup %4326  ;;  %v2765_v31 = vadd.f32 1.0, %v4325_v25  ;;  %v2772_v51 = vmul.f32 %v2764_v35, %v2740_v43 }
 0x89d   : > { %v4329_v58 = vpop.eup %4328  ;;  %v2766_v28 = vadd.f32 1.0, %v4327_v54  ;;  %v2771_v44 = vmul.f32 %v2763_v27, %v2739_v26 }
 0x89e   : > { %v4331_v29 = vpop.eup %4330  ;;  %v2768_v33 = vadd.f32 1.0, %v4329_v58  ;;  %v2773_v49 = vmul.f32 %v2765_v31, %v2741_v39 }
 0x89f   : > { %v4333_v34 = vpop.eup %4332  ;;  %v2767_v38 = vadd.f32 1.0, %v4331_v29  ;;  %v2774_v40 = vmul.f32 %v2766_v28, %v2742_v32 }
 0x8a0   : > { %v2769_v42 = vadd.f32 1.0, %v4333_v34  ;;  %v2776_v46 = vmul.f32 %v2768_v33, %v2744_v36 }
 0x8a1   : > { %v2775_v47 = vmul.f32 %v2767_v38, %v2743_v37  ;;  %v2778_v55 = vpack.c.bf16 %v2774_v40, %v2770_v48 }
 0x8a2   : > { %v2777_v50 = vmul.f32 %v2769_v42, %v2745_v41  ;;  %v2780_v61 = vpack.c.bf16 %v2776_v46, %v2772_v51 }
 0x8a3   : > { %v2779_v52 = vpack.c.bf16 %v2775_v47, %v2771_v44 }
 0x8a4   : > { %v2781_v56 = vpack.c.bf16 %v2777_v50, %v2773_v49 }
 0x8a5   : > { %3077 = vmatprep.mubr.bf16.mxu1 %v2779_v52 }
 0x8a6   : > { %3118 = vmatprep.mubr.bf16.mxu0 %v2781_v56  ;;  %3078 = vmatmul.mubr.bf16.vlgmr.msra.gmra.mxu1 %v2778_v55 }
 0x8a7   : > { %3119 = vmatmul.mubr.bf16.vlgmr.msra.gmra.mxu0 %v2780_v61 }
 0x966   : > { %v3696_v62 = vpop.f32.mrf.mxu1 }
 0x967   : > { %v3718_v63 = vpop.f32.mrf.mxu0 }
 0x968   : > { %v3697_v0 = vpop.f32.mrf.mxu1 }
 0x969   : > { %v3698_v1 = vadd.f32 %v3697_v0, %v3696_v62  ;;  %v3719_v2 = vpop.f32.mrf.mxu0 }
 0x96a   : > { %v3699_v3 = vpop.f32.mrf.mxu1  ;;  %v3720_v6 = vadd.f32 %v3719_v2, %v3718_v63 }
 0x96b   : > { %v3080_v5 = vadd.f32 %v3698_v1, %v3507_v4  ;;  %v3721_v7 = vpop.f32.mrf.mxu0 }
 0x96c   : > { %v3700_v8 = vpop.f32.mrf.mxu1 }
 0x96d   : > { %v3121_v9 = vadd.f32 %v3720_v6, %v3080_v5  ;;  %v3701_v10 = vadd.f32 %v3700_v8, %v3699_v3  ;;  %v3722_v11 = vpop.f32.mrf.mxu0 }
 0x96e   : > { %v3723_v13 = vadd.f32 %v3722_v11, %v3721_v7 }
 0x96f   : > { %v3127_v45 = vadd.f32 %v3121_v9, %v5077_v18  ;;  %v3083_v12 = vadd.f32 %v3701_v10, %v3507_v4 }
 0x971   : > { %3129 = vst [vmem:[%s460_s18] sm:$0xff] %v3127_v45  ;;  %v3124_v14 = vadd.f32 %v3723_v13, %v3083_v12 }
 0x973   : > { %v3128_v15 = vadd.f32 %v3124_v14, %v5081_v59 }
 0x975   : > { %3130 = vst [vmem:[%s460_s18 + $0x8] sm:$0xff] %v3128_v15 }
 0x976   : > { %4349 = shalt.err (!%p4346_p3)
}
 0x977   : > { %s4350_s0 = scalar_lea.hbm %s5309_s15, 256  ;;  %s4354_s21 = scalar_lea.hbm %s5365_s14, 512 }
 0x978   : > { %p4351_p4 = scmp.ne.s32.totalorder %s5309_s15, %s4350_s0  ;;  %p4355_p9 = scmp.lt.s32.totalorder %s5309_s15, %s5365_s14 }
 0x979   : > { %p4356_p10 = scmp.lt.s32.totalorder %s4354_s21, %s4350_s0 }
 0x97a   : > { %p4352_p7 = pnand %p4351_p4, %p4520_p5 }
 0x97b   : > { %p4357_p11 = por %p4356_p10, %p4355_p9 }
 0x97c   : > { %p4353_p8 = pneg %p4352_p7 }
 0x97e   : > { %p4358_p12 = pnand %p4357_p11, %p4353_p8 }
 0x980   : > { %4361 = shalt.err (!%p4358_p12)
}
 0x981   : > { %s4405_s25 = smov 128   ;;  %s4406_s26 = smov 8  }
 0x982   : > { %4032 = dma.vmem_to_hbm [thread:$0]  (%p4520_p5), %s5303_s28, 256, %s5309_s15, %s5311_s22, %s4405_s25, %s4405_s25, %s4406_s26  }
 0x983 PF: > { %p4038_p13 = scmp.ge.s32.totalorder %s4396_s16, 2  ;;  %s3160_s27 = sand.u32 1, %s4384_s29  }
 0x984   : > { %s3161_s0 = scalar_lea.sflag [#allocation3], %s3160_s27 }
 0x985   : > { %p4035_p0 = pnand %p4038_p13, %p4524_p6 }
 0x987   : > { %p4036_p1 = pneg %p4035_p0 }
 0x989   : > { %4379 = dma.done.wait (%p4036_p1), %s3161_s0, 256  }
 0x98a   : > { %4381 = vsyncadd (%p4036_p1), %s3161_s0, 4294967040  ;;  %s5375_s18 = sld [smem:[#allocation5_spill]]  ;;  %p24_p2 = scmp.ge.s32.totalorder %s4507_s19, 4  }
 0x98b   : > { %s5376_s15 = sld [smem:[#allocation6_spill]]  ;;  %s5377_s29 = smov %s4388_s30 }
 0x98c   : > { %s5379_s16 = smov %s4507_s19  ;;  %26 = sbr.rel (!%p24_p2) target bundleno = 6 (0x6), region = 120 }
 0x990   : > { %s5378_s30 = smov %s5375_s18 }
 0x991   :  { %3166 = vsyncpa [#allocation3], 1 }
 0x992   :  { %3168 = vsyncpa [#allocation3 + $0x1], 1 }

</bundles_post_ra>
